<compile_context>
chip_gen: v7x
topology: tpu7x:2x2x1
jax: 0.10.0
libtpu: 0.0.40
codegen_flags: <defaults>
</compile_context>

<pallas_src>
import jax
import jax.numpy as jnp
from jax.experimental import pallas as pl
from jax.experimental.pallas import tpu as pltpu


def _seg_decoder_kernel(x_ref, w_ref, b_ref, rwt_ref, rh_ref, o_ref):
    # x_ref:   (C_in, N*H, W)               float32, VMEM
    # w_ref:   (C_in, n_class)              float32, SMEM (1x1 conv weight, transposed)
    # b_ref:   (n_class,)                   float32, SMEM (conv bias)
    # rwt_ref: (W, img_w)                   bfloat16, VMEM (Rw^T, W-direction bilinear)
    # rh_ref:  (img_h, H)                   bfloat16, VMEM (Rh,  H-direction bilinear)
    # o_ref:   (N, n_class, img_h, img_w)   float32, VMEM
    c_in, nh, _ = x_ref.shape
    n_class = w_ref.shape[1]
    _, h_in = rh_ref.shape
    n_batch = nh // h_in

    # ---- 1x1 conv on the VPU: unrolled scalar-MAC over input channels. -------
    # Channel reduction C_in -> n_class happens before the (bigger) resize
    # matmuls; SMEM scalars broadcast into the vector lanes.
    z_rows = []
    for o in range(n_class):
        acc = x_ref[0] * w_ref[0, o]
        for c in range(1, c_in):
            acc = acc + x_ref[c] * w_ref[c, o]
        z_rows.append(acc + b_ref[o])
    # (n_class*N*H, W); row index = (o * N + n) * H + h
    z = jnp.concatenate(z_rows, axis=0)

    # ---- W-direction bilinear resize: one MXU matmul, M = n_class*N*H. -------
    t = jnp.dot(z.astype(jnp.bfloat16), rwt_ref[...],
                preferred_element_type=jnp.float32)        # (n_class*N*H, img_w)
    t = t.astype(jnp.bfloat16)
    rh = rh_ref[...]

    # ---- H-direction bilinear resize per (batch, class) image. ---------------
    # Each store writes a full (img_h, img_w) block (img_w chosen lane-dense in
    # the demo), directly in the module's (N, n_class, img_h, img_w) layout.
    for o in range(n_class):
        for n in range(n_batch):
            r0 = (o * n_batch + n) * h_in
            blk = t[r0:r0 + h_in, :]                       # (H, img_w)
            o_ref[n, o, :, :] = jnp.dot(
                rh, blk, preferred_element_type=jnp.float32
            ).astype(o_ref.dtype)


def _bilinear_matrix(out_size, in_size):
    """Row-resampling matrix matching F.interpolate(mode='bilinear',
    align_corners=False): (R @ v) resamples a length-in_size signal v."""
    scale = in_size / out_size
    dst = jnp.arange(out_size, dtype=jnp.float32)
    src = (dst + 0.5) * scale - 0.5
    src = jnp.maximum(src, 0.0)                    # PyTorch clamps negative coords
    i0 = jnp.floor(src).astype(jnp.int32)
    i1 = jnp.minimum(i0 + 1, in_size - 1)
    w1 = src - i0.astype(jnp.float32)
    w0 = 1.0 - w1
    return (w0[:, None] * jax.nn.one_hot(i0, in_size, dtype=jnp.float32)
            + w1[:, None] * jax.nn.one_hot(i1, in_size, dtype=jnp.float32))


def seg_decoder_forward(x, weight, bias, img_h, img_w):
    """x: (N, C_in, H, W) f32; weight: (n_class, C_in); bias: (n_class,)."""
    N, C_in, H, W = x.shape
    n_class = weight.shape[0]

    # Separable bilinear operators: constant for fixed shapes (constant-folded
    # under jit).  bf16 halves their VMEM/DMA footprint; accumulation stays f32.
    rh = _bilinear_matrix(img_h, H).astype(jnp.bfloat16)       # (img_h, H)
    rwt = _bilinear_matrix(img_w, W).T.astype(jnp.bfloat16)    # (W, img_w)

    # Fold the batch into one invocation: channel-major pixel slab (C_in, N*H, W).
    xk = jnp.transpose(x, (1, 0, 2, 3)).reshape(C_in, N * H, W)
    wk = weight.T                                              # (C_in, n_class)

    # Single grid-free invocation: all operands fit comfortably in VMEM/SMEM on
    # v5e/v6e/v7x at these sizes, with no pipelining / double-buffering overhead.
    return pl.pallas_call(
        _seg_decoder_kernel,
        out_shape=jax.ShapeDtypeStruct((N, n_class, img_h, img_w), jnp.float32),
        in_specs=[
            pl.BlockSpec(memory_space=pltpu.MemorySpace.VMEM),   # x slab
            pl.BlockSpec(memory_space=pltpu.MemorySpace.SMEM),   # conv weight
            pl.BlockSpec(memory_space=pltpu.MemorySpace.SMEM),   # conv bias
            pl.BlockSpec(memory_space=pltpu.MemorySpace.VMEM),   # Rw^T
            pl.BlockSpec(memory_space=pltpu.MemorySpace.VMEM),   # Rh
        ],
        out_specs=pl.BlockSpec(memory_space=pltpu.MemorySpace.VMEM),
    )(xk, wk, bias, rwt, rh)


def _reference(x, weight, bias, img_h, img_w):
    # Pure-JAX f32 reference: 1x1 conv + separable bilinear resize.
    z = jnp.einsum("oc,nchw->nohw", weight, x) + bias[None, :, None, None]
    Rh = _bilinear_matrix(img_h, x.shape[2])
    Rw = _bilinear_matrix(img_w, x.shape[3])
    return jnp.einsum("ph,nohw,qw->nopq", Rh, z, Rw)


if __name__ == "__main__":
    # prior_fea_channels=4, refine_layers=3 -> C_in = 12; n_class = 5.
    # Feature map 16x16 upsampled to (img_h, img_w) = (32, 128); img_w is a
    # multiple of 128 so the final stores stay lane-dense.
    N, C_in, H, W = 2, 12, 16, 16
    n_class, img_h, img_w = 5, 32, 128

    key = jax.random.PRNGKey(0)
    kx, kw, kb = jax.random.split(key, 3)
    x = jax.random.normal(kx, (N, C_in, H, W), dtype=jnp.float32)
    # Conv2d(C_in, n_class, kernel_size=1) weights -> (n_class, C_in, 1, 1) squeezed.
    weight = 0.1 * jax.random.normal(kw, (n_class, C_in), dtype=jnp.float32)
    bias = 0.1 * jax.random.normal(kb, (n_class,), dtype=jnp.float32)

    fwd = jax.jit(seg_decoder_forward, static_argnums=(3, 4))
    out = jax.block_until_ready(fwd(x, weight, bias, img_h, img_w))

    ref = _reference(x, weight, bias, img_h, img_w)
    assert out.shape == (N, n_class, img_h, img_w)
    # bf16 MXU operands with f32 accumulation -> relaxed tolerance.
    assert jnp.allclose(out, ref, atol=2e-2, rtol=2e-2), \
        float(jnp.max(jnp.abs(out - ref)))

    print("KERNEL_OK")
</pallas_src>

<mosaic_0001>
module attributes {stable_mosaic.version = 11 : i64} {
  func.func @_seg_decoder_kernel(%arg0: memref<12x32x16xf32, #tpu.memory_space<vmem>>, %arg1: memref<12x5xf32, #tpu.memory_space<smem>>, %arg2: memref<5xf32, #tpu.memory_space<smem>>, %arg3: memref<16x128xbf16, #tpu.memory_space<vmem>>, %arg4: memref<32x16xbf16, #tpu.memory_space<vmem>>, %arg5: memref<2x5x32x128xf32, #tpu.memory_space<vmem>>) attributes {dimension_semantics = [], scalar_prefetch = 0 : i64, scratch_operands = 0 : i64, tpu.core_type = #tpu.core_type<tc>} {
    %c0 = arith.constant 0 : index
    %c0_0 = arith.constant 0 : index
    %c0_1 = arith.constant 0 : index
    %0 = vector.load %arg0[%c0, %c0_0, %c0_1] : memref<12x32x16xf32, #tpu.memory_space<vmem>>, vector<1x32x16xf32>
    %1 = vector.shape_cast %0 : vector<1x32x16xf32> to vector<32x16xf32>
    %c0_2 = arith.constant 0 : index
    %c0_3 = arith.constant 0 : index
    %2 = memref.load %arg1[%c0_2, %c0_3] : memref<12x5xf32, #tpu.memory_space<smem>>
    %3 = vector.broadcast %2 : f32 to vector<32x16xf32>
    %4 = arith.mulf %1, %3 : vector<32x16xf32>
    %c1 = arith.constant 1 : index
    %c0_4 = arith.constant 0 : index
    %c0_5 = arith.constant 0 : index
    %5 = vector.load %arg0[%c1, %c0_4, %c0_5] : memref<12x32x16xf32, #tpu.memory_space<vmem>>, vector<1x32x16xf32>
    %6 = vector.shape_cast %5 : vector<1x32x16xf32> to vector<32x16xf32>
    %c1_6 = arith.constant 1 : index
    %c0_7 = arith.constant 0 : index
    %7 = memref.load %arg1[%c1_6, %c0_7] : memref<12x5xf32, #tpu.memory_space<smem>>
    %8 = vector.broadcast %7 : f32 to vector<32x16xf32>
    %9 = arith.mulf %6, %8 : vector<32x16xf32>
    %10 = arith.addf %4, %9 : vector<32x16xf32>
    %c2 = arith.constant 2 : index
    %c0_8 = arith.constant 0 : index
    %c0_9 = arith.constant 0 : index
    %11 = vector.load %arg0[%c2, %c0_8, %c0_9] : memref<12x32x16xf32, #tpu.memory_space<vmem>>, vector<1x32x16xf32>
    %12 = vector.shape_cast %11 : vector<1x32x16xf32> to vector<32x16xf32>
    %c2_10 = arith.constant 2 : index
    %c0_11 = arith.constant 0 : index
    %13 = memref.load %arg1[%c2_10, %c0_11] : memref<12x5xf32, #tpu.memory_space<smem>>
    %14 = vector.broadcast %13 : f32 to vector<32x16xf32>
    %15 = arith.mulf %12, %14 : vector<32x16xf32>
    %16 = arith.addf %10, %15 : vector<32x16xf32>
    %c3 = arith.constant 3 : index
    %c0_12 = arith.constant 0 : index
    %c0_13 = arith.constant 0 : index
    %17 = vector.load %arg0[%c3, %c0_12, %c0_13] : memref<12x32x16xf32, #tpu.memory_space<vmem>>, vector<1x32x16xf32>
    %18 = vector.shape_cast %17 : vector<1x32x16xf32> to vector<32x16xf32>
    %c3_14 = arith.constant 3 : index
    %c0_15 = arith.constant 0 : index
    %19 = memref.load %arg1[%c3_14, %c0_15] : memref<12x5xf32, #tpu.memory_space<smem>>
    %20 = vector.broadcast %19 : f32 to vector<32x16xf32>
    %21 = arith.mulf %18, %20 : vector<32x16xf32>
    %22 = arith.addf %16, %21 : vector<32x16xf32>
    %c4 = arith.constant 4 : index
    %c0_16 = arith.constant 0 : index
    %c0_17 = arith.constant 0 : index
    %23 = vector.load %arg0[%c4, %c0_16, %c0_17] : memref<12x32x16xf32, #tpu.memory_space<vmem>>, vector<1x32x16xf32>
    %24 = vector.shape_cast %23 : vector<1x32x16xf32> to vector<32x16xf32>
    %c4_18 = arith.constant 4 : index
    %c0_19 = arith.constant 0 : index
    %25 = memref.load %arg1[%c4_18, %c0_19] : memref<12x5xf32, #tpu.memory_space<smem>>
    %26 = vector.broadcast %25 : f32 to vector<32x16xf32>
    %27 = arith.mulf %24, %26 : vector<32x16xf32>
    %28 = arith.addf %22, %27 : vector<32x16xf32>
    %c5 = arith.constant 5 : index
    %c0_20 = arith.constant 0 : index
    %c0_21 = arith.constant 0 : index
    %29 = vector.load %arg0[%c5, %c0_20, %c0_21] : memref<12x32x16xf32, #tpu.memory_space<vmem>>, vector<1x32x16xf32>
    %30 = vector.shape_cast %29 : vector<1x32x16xf32> to vector<32x16xf32>
    %c5_22 = arith.constant 5 : index
    %c0_23 = arith.constant 0 : index
    %31 = memref.load %arg1[%c5_22, %c0_23] : memref<12x5xf32, #tpu.memory_space<smem>>
    %32 = vector.broadcast %31 : f32 to vector<32x16xf32>
    %33 = arith.mulf %30, %32 : vector<32x16xf32>
    %34 = arith.addf %28, %33 : vector<32x16xf32>
    %c6 = arith.constant 6 : index
    %c0_24 = arith.constant 0 : index
    %c0_25 = arith.constant 0 : index
    %35 = vector.load %arg0[%c6, %c0_24, %c0_25] : memref<12x32x16xf32, #tpu.memory_space<vmem>>, vector<1x32x16xf32>
    %36 = vector.shape_cast %35 : vector<1x32x16xf32> to vector<32x16xf32>
    %c6_26 = arith.constant 6 : index
    %c0_27 = arith.constant 0 : index
    %37 = memref.load %arg1[%c6_26, %c0_27] : memref<12x5xf32, #tpu.memory_space<smem>>
    %38 = vector.broadcast %37 : f32 to vector<32x16xf32>
    %39 = arith.mulf %36, %38 : vector<32x16xf32>
    %40 = arith.addf %34, %39 : vector<32x16xf32>
    %c7 = arith.constant 7 : index
    %c0_28 = arith.constant 0 : index
    %c0_29 = arith.constant 0 : index
    %41 = vector.load %arg0[%c7, %c0_28, %c0_29] : memref<12x32x16xf32, #tpu.memory_space<vmem>>, vector<1x32x16xf32>
    %42 = vector.shape_cast %41 : vector<1x32x16xf32> to vector<32x16xf32>
    %c7_30 = arith.constant 7 : index
    %c0_31 = arith.constant 0 : index
    %43 = memref.load %arg1[%c7_30, %c0_31] : memref<12x5xf32, #tpu.memory_space<smem>>
    %44 = vector.broadcast %43 : f32 to vector<32x16xf32>
    %45 = arith.mulf %42, %44 : vector<32x16xf32>
    %46 = arith.addf %40, %45 : vector<32x16xf32>
    %c8 = arith.constant 8 : index
    %c0_32 = arith.constant 0 : index
    %c0_33 = arith.constant 0 : index
    %47 = vector.load %arg0[%c8, %c0_32, %c0_33] : memref<12x32x16xf32, #tpu.memory_space<vmem>>, vector<1x32x16xf32>
    %48 = vector.shape_cast %47 : vector<1x32x16xf32> to vector<32x16xf32>
    %c8_34 = arith.constant 8 : index
    %c0_35 = arith.constant 0 : index
    %49 = memref.load %arg1[%c8_34, %c0_35] : memref<12x5xf32, #tpu.memory_space<smem>>
    %50 = vector.broadcast %49 : f32 to vector<32x16xf32>
    %51 = arith.mulf %48, %50 : vector<32x16xf32>
    %52 = arith.addf %46, %51 : vector<32x16xf32>
    %c9 = arith.constant 9 : index
    %c0_36 = arith.constant 0 : index
    %c0_37 = arith.constant 0 : index
    %53 = vector.load %arg0[%c9, %c0_36, %c0_37] : memref<12x32x16xf32, #tpu.memory_space<vmem>>, vector<1x32x16xf32>
    %54 = vector.shape_cast %53 : vector<1x32x16xf32> to vector<32x16xf32>
    %c9_38 = arith.constant 9 : index
    %c0_39 = arith.constant 0 : index
    %55 = memref.load %arg1[%c9_38, %c0_39] : memref<12x5xf32, #tpu.memory_space<smem>>
    %56 = vector.broadcast %55 : f32 to vector<32x16xf32>
    %57 = arith.mulf %54, %56 : vector<32x16xf32>
    %58 = arith.addf %52, %57 : vector<32x16xf32>
    %c10 = arith.constant 10 : index
    %c0_40 = arith.constant 0 : index
    %c0_41 = arith.constant 0 : index
    %59 = vector.load %arg0[%c10, %c0_40, %c0_41] : memref<12x32x16xf32, #tpu.memory_space<vmem>>, vector<1x32x16xf32>
    %60 = vector.shape_cast %59 : vector<1x32x16xf32> to vector<32x16xf32>
    %c10_42 = arith.constant 10 : index
    %c0_43 = arith.constant 0 : index
    %61 = memref.load %arg1[%c10_42, %c0_43] : memref<12x5xf32, #tpu.memory_space<smem>>
    %62 = vector.broadcast %61 : f32 to vector<32x16xf32>
    %63 = arith.mulf %60, %62 : vector<32x16xf32>
    %64 = arith.addf %58, %63 : vector<32x16xf32>
    %c11 = arith.constant 11 : index
    %c0_44 = arith.constant 0 : index
    %c0_45 = arith.constant 0 : index
    %65 = vector.load %arg0[%c11, %c0_44, %c0_45] : memref<12x32x16xf32, #tpu.memory_space<vmem>>, vector<1x32x16xf32>
    %66 = vector.shape_cast %65 : vector<1x32x16xf32> to vector<32x16xf32>
    %c11_46 = arith.constant 11 : index
    %c0_47 = arith.constant 0 : index
    %67 = memref.load %arg1[%c11_46, %c0_47] : memref<12x5xf32, #tpu.memory_space<smem>>
    %68 = vector.broadcast %67 : f32 to vector<32x16xf32>
    %69 = arith.mulf %66, %68 : vector<32x16xf32>
    %70 = arith.addf %64, %69 : vector<32x16xf32>
    %c0_48 = arith.constant 0 : index
    %71 = memref.load %arg2[%c0_48] : memref<5xf32, #tpu.memory_space<smem>>
    %72 = vector.broadcast %71 : f32 to vector<32x16xf32>
    %73 = arith.addf %70, %72 : vector<32x16xf32>
    %c0_49 = arith.constant 0 : index
    %c0_50 = arith.constant 0 : index
    %c0_51 = arith.constant 0 : index
    %74 = vector.load %arg0[%c0_49, %c0_50, %c0_51] : memref<12x32x16xf32, #tpu.memory_space<vmem>>, vector<1x32x16xf32>
    %75 = vector.shape_cast %74 : vector<1x32x16xf32> to vector<32x16xf32>
    %c0_52 = arith.constant 0 : index
    %c1_53 = arith.constant 1 : index
    %76 = memref.load %arg1[%c0_52, %c1_53] : memref<12x5xf32, #tpu.memory_space<smem>>
    %77 = vector.broadcast %76 : f32 to vector<32x16xf32>
    %78 = arith.mulf %75, %77 : vector<32x16xf32>
    %c1_54 = arith.constant 1 : index
    %c0_55 = arith.constant 0 : index
    %c0_56 = arith.constant 0 : index
    %79 = vector.load %arg0[%c1_54, %c0_55, %c0_56] : memref<12x32x16xf32, #tpu.memory_space<vmem>>, vector<1x32x16xf32>
    %80 = vector.shape_cast %79 : vector<1x32x16xf32> to vector<32x16xf32>
    %c1_57 = arith.constant 1 : index
    %c1_58 = arith.constant 1 : index
    %81 = memref.load %arg1[%c1_57, %c1_58] : memref<12x5xf32, #tpu.memory_space<smem>>
    %82 = vector.broadcast %81 : f32 to vector<32x16xf32>
    %83 = arith.mulf %80, %82 : vector<32x16xf32>
    %84 = arith.addf %78, %83 : vector<32x16xf32>
    %c2_59 = arith.constant 2 : index
    %c0_60 = arith.constant 0 : index
    %c0_61 = arith.constant 0 : index
    %85 = vector.load %arg0[%c2_59, %c0_60, %c0_61] : memref<12x32x16xf32, #tpu.memory_space<vmem>>, vector<1x32x16xf32>
    %86 = vector.shape_cast %85 : vector<1x32x16xf32> to vector<32x16xf32>
    %c2_62 = arith.constant 2 : index
    %c1_63 = arith.constant 1 : index
    %87 = memref.load %arg1[%c2_62, %c1_63] : memref<12x5xf32, #tpu.memory_space<smem>>
    %88 = vector.broadcast %87 : f32 to vector<32x16xf32>
    %89 = arith.mulf %86, %88 : vector<32x16xf32>
    %90 = arith.addf %84, %89 : vector<32x16xf32>
    %c3_64 = arith.constant 3 : index
    %c0_65 = arith.constant 0 : index
    %c0_66 = arith.constant 0 : index
    %91 = vector.load %arg0[%c3_64, %c0_65, %c0_66] : memref<12x32x16xf32, #tpu.memory_space<vmem>>, vector<1x32x16xf32>
    %92 = vector.shape_cast %91 : vector<1x32x16xf32> to vector<32x16xf32>
    %c3_67 = arith.constant 3 : index
    %c1_68 = arith.constant 1 : index
    %93 = memref.load %arg1[%c3_67, %c1_68] : memref<12x5xf32, #tpu.memory_space<smem>>
    %94 = vector.broadcast %93 : f32 to vector<32x16xf32>
    %95 = arith.mulf %92, %94 : vector<32x16xf32>
    %96 = arith.addf %90, %95 : vector<32x16xf32>
    %c4_69 = arith.constant 4 : index
    %c0_70 = arith.constant 0 : index
    %c0_71 = arith.constant 0 : index
    %97 = vector.load %arg0[%c4_69, %c0_70, %c0_71] : memref<12x32x16xf32, #tpu.memory_space<vmem>>, vector<1x32x16xf32>
    %98 = vector.shape_cast %97 : vector<1x32x16xf32> to vector<32x16xf32>
    %c4_72 = arith.constant 4 : index
    %c1_73 = arith.constant 1 : index
    %99 = memref.load %arg1[%c4_72, %c1_73] : memref<12x5xf32, #tpu.memory_space<smem>>
    %100 = vector.broadcast %99 : f32 to vector<32x16xf32>
    %101 = arith.mulf %98, %100 : vector<32x16xf32>
    %102 = arith.addf %96, %101 : vector<32x16xf32>
    %c5_74 = arith.constant 5 : index
    %c0_75 = arith.constant 0 : index
    %c0_76 = arith.constant 0 : index
    %103 = vector.load %arg0[%c5_74, %c0_75, %c0_76] : memref<12x32x16xf32, #tpu.memory_space<vmem>>, vector<1x32x16xf32>
    %104 = vector.shape_cast %103 : vector<1x32x16xf32> to vector<32x16xf32>
    %c5_77 = arith.constant 5 : index
    %c1_78 = arith.constant 1 : index
    %105 = memref.load %arg1[%c5_77, %c1_78] : memref<12x5xf32, #tpu.memory_space<smem>>
    %106 = vector.broadcast %105 : f32 to vector<32x16xf32>
    %107 = arith.mulf %104, %106 : vector<32x16xf32>
    %108 = arith.addf %102, %107 : vector<32x16xf32>
    %c6_79 = arith.constant 6 : index
    %c0_80 = arith.constant 0 : index
    %c0_81 = arith.constant 0 : index
    %109 = vector.load %arg0[%c6_79, %c0_80, %c0_81] : memref<12x32x16xf32, #tpu.memory_space<vmem>>, vector<1x32x16xf32>
    %110 = vector.shape_cast %109 : vector<1x32x16xf32> to vector<32x16xf32>
    %c6_82 = arith.constant 6 : index
    %c1_83 = arith.constant 1 : index
    %111 = memref.load %arg1[%c6_82, %c1_83] : memref<12x5xf32, #tpu.memory_space<smem>>
    %112 = vector.broadcast %111 : f32 to vector<32x16xf32>
    %113 = arith.mulf %110, %112 : vector<32x16xf32>
    %114 = arith.addf %108, %113 : vector<32x16xf32>
    %c7_84 = arith.constant 7 : index
    %c0_85 = arith.constant 0 : index
    %c0_86 = arith.constant 0 : index
    %115 = vector.load %arg0[%c7_84, %c0_85, %c0_86] : memref<12x32x16xf32, #tpu.memory_space<vmem>>, vector<1x32x16xf32>
    %116 = vector.shape_cast %115 : vector<1x32x16xf32> to vector<32x16xf32>
    %c7_87 = arith.constant 7 : index
    %c1_88 = arith.constant 1 : index
    %117 = memref.load %arg1[%c7_87, %c1_88] : memref<12x5xf32, #tpu.memory_space<smem>>
    %118 = vector.broadcast %117 : f32 to vector<32x16xf32>
    %119 = arith.mulf %116, %118 : vector<32x16xf32>
    %120 = arith.addf %114, %119 : vector<32x16xf32>
    %c8_89 = arith.constant 8 : index
    %c0_90 = arith.constant 0 : index
    %c0_91 = arith.constant 0 : index
    %121 = vector.load %arg0[%c8_89, %c0_90, %c0_91] : memref<12x32x16xf32, #tpu.memory_space<vmem>>, vector<1x32x16xf32>
    %122 = vector.shape_cast %121 : vector<1x32x16xf32> to vector<32x16xf32>
    %c8_92 = arith.constant 8 : index
    %c1_93 = arith.constant 1 : index
    %123 = memref.load %arg1[%c8_92, %c1_93] : memref<12x5xf32, #tpu.memory_space<smem>>
    %124 = vector.broadcast %123 : f32 to vector<32x16xf32>
    %125 = arith.mulf %122, %124 : vector<32x16xf32>
    %126 = arith.addf %120, %125 : vector<32x16xf32>
    %c9_94 = arith.constant 9 : index
    %c0_95 = arith.constant 0 : index
    %c0_96 = arith.constant 0 : index
    %127 = vector.load %arg0[%c9_94, %c0_95, %c0_96] : memref<12x32x16xf32, #tpu.memory_space<vmem>>, vector<1x32x16xf32>
    %128 = vector.shape_cast %127 : vector<1x32x16xf32> to vector<32x16xf32>
    %c9_97 = arith.constant 9 : index
    %c1_98 = arith.constant 1 : index
    %129 = memref.load %arg1[%c9_97, %c1_98] : memref<12x5xf32, #tpu.memory_space<smem>>
    %130 = vector.broadcast %129 : f32 to vector<32x16xf32>
    %131 = arith.mulf %128, %130 : vector<32x16xf32>
    %132 = arith.addf %126, %131 : vector<32x16xf32>
    %c10_99 = arith.constant 10 : index
    %c0_100 = arith.constant 0 : index
    %c0_101 = arith.constant 0 : index
    %133 = vector.load %arg0[%c10_99, %c0_100, %c0_101] : memref<12x32x16xf32, #tpu.memory_space<vmem>>, vector<1x32x16xf32>
    %134 = vector.shape_cast %133 : vector<1x32x16xf32> to vector<32x16xf32>
    %c10_102 = arith.constant 10 : index
    %c1_103 = arith.constant 1 : index
    %135 = memref.load %arg1[%c10_102, %c1_103] : memref<12x5xf32, #tpu.memory_space<smem>>
    %136 = vector.broadcast %135 : f32 to vector<32x16xf32>
    %137 = arith.mulf %134, %136 : vector<32x16xf32>
    %138 = arith.addf %132, %137 : vector<32x16xf32>
    %c11_104 = arith.constant 11 : index
    %c0_105 = arith.constant 0 : index
    %c0_106 = arith.constant 0 : index
    %139 = vector.load %arg0[%c11_104, %c0_105, %c0_106] : memref<12x32x16xf32, #tpu.memory_space<vmem>>, vector<1x32x16xf32>
    %140 = vector.shape_cast %139 : vector<1x32x16xf32> to vector<32x16xf32>
    %c11_107 = arith.constant 11 : index
    %c1_108 = arith.constant 1 : index
    %141 = memref.load %arg1[%c11_107, %c1_108] : memref<12x5xf32, #tpu.memory_space<smem>>
    %142 = vector.broadcast %141 : f32 to vector<32x16xf32>
    %143 = arith.mulf %140, %142 : vector<32x16xf32>
    %144 = arith.addf %138, %143 : vector<32x16xf32>
    %c1_109 = arith.constant 1 : index
    %145 = memref.load %arg2[%c1_109] : memref<5xf32, #tpu.memory_space<smem>>
    %146 = vector.broadcast %145 : f32 to vector<32x16xf32>
    %147 = arith.addf %144, %146 : vector<32x16xf32>
    %c0_110 = arith.constant 0 : index
    %c0_111 = arith.constant 0 : index
    %c0_112 = arith.constant 0 : index
    %148 = vector.load %arg0[%c0_110, %c0_111, %c0_112] : memref<12x32x16xf32, #tpu.memory_space<vmem>>, vector<1x32x16xf32>
    %149 = vector.shape_cast %148 : vector<1x32x16xf32> to vector<32x16xf32>
    %c0_113 = arith.constant 0 : index
    %c2_114 = arith.constant 2 : index
    %150 = memref.load %arg1[%c0_113, %c2_114] : memref<12x5xf32, #tpu.memory_space<smem>>
    %151 = vector.broadcast %150 : f32 to vector<32x16xf32>
    %152 = arith.mulf %149, %151 : vector<32x16xf32>
    %c1_115 = arith.constant 1 : index
    %c0_116 = arith.constant 0 : index
    %c0_117 = arith.constant 0 : index
    %153 = vector.load %arg0[%c1_115, %c0_116, %c0_117] : memref<12x32x16xf32, #tpu.memory_space<vmem>>, vector<1x32x16xf32>
    %154 = vector.shape_cast %153 : vector<1x32x16xf32> to vector<32x16xf32>
    %c1_118 = arith.constant 1 : index
    %c2_119 = arith.constant 2 : index
    %155 = memref.load %arg1[%c1_118, %c2_119] : memref<12x5xf32, #tpu.memory_space<smem>>
    %156 = vector.broadcast %155 : f32 to vector<32x16xf32>
    %157 = arith.mulf %154, %156 : vector<32x16xf32>
    %158 = arith.addf %152, %157 : vector<32x16xf32>
    %c2_120 = arith.constant 2 : index
    %c0_121 = arith.constant 0 : index
    %c0_122 = arith.constant 0 : index
    %159 = vector.load %arg0[%c2_120, %c0_121, %c0_122] : memref<12x32x16xf32, #tpu.memory_space<vmem>>, vector<1x32x16xf32>
    %160 = vector.shape_cast %159 : vector<1x32x16xf32> to vector<32x16xf32>
    %c2_123 = arith.constant 2 : index
    %c2_124 = arith.constant 2 : index
    %161 = memref.load %arg1[%c2_123, %c2_124] : memref<12x5xf32, #tpu.memory_space<smem>>
    %162 = vector.broadcast %161 : f32 to vector<32x16xf32>
    %163 = arith.mulf %160, %162 : vector<32x16xf32>
    %164 = arith.addf %158, %163 : vector<32x16xf32>
    %c3_125 = arith.constant 3 : index
    %c0_126 = arith.constant 0 : index
    %c0_127 = arith.constant 0 : index
    %165 = vector.load %arg0[%c3_125, %c0_126, %c0_127] : memref<12x32x16xf32, #tpu.memory_space<vmem>>, vector<1x32x16xf32>
    %166 = vector.shape_cast %165 : vector<1x32x16xf32> to vector<32x16xf32>
    %c3_128 = arith.constant 3 : index
    %c2_129 = arith.constant 2 : index
    %167 = memref.load %arg1[%c3_128, %c2_129] : memref<12x5xf32, #tpu.memory_space<smem>>
    %168 = vector.broadcast %167 : f32 to vector<32x16xf32>
    %169 = arith.mulf %166, %168 : vector<32x16xf32>
    %170 = arith.addf %164, %169 : vector<32x16xf32>
    %c4_130 = arith.constant 4 : index
    %c0_131 = arith.constant 0 : index
    %c0_132 = arith.constant 0 : index
    %171 = vector.load %arg0[%c4_130, %c0_131, %c0_132] : memref<12x32x16xf32, #tpu.memory_space<vmem>>, vector<1x32x16xf32>
    %172 = vector.shape_cast %171 : vector<1x32x16xf32> to vector<32x16xf32>
    %c4_133 = arith.constant 4 : index
    %c2_134 = arith.constant 2 : index
    %173 = memref.load %arg1[%c4_133, %c2_134] : memref<12x5xf32, #tpu.memory_space<smem>>
    %174 = vector.broadcast %173 : f32 to vector<32x16xf32>
    %175 = arith.mulf %172, %174 : vector<32x16xf32>
    %176 = arith.addf %170, %175 : vector<32x16xf32>
    %c5_135 = arith.constant 5 : index
    %c0_136 = arith.constant 0 : index
    %c0_137 = arith.constant 0 : index
    %177 = vector.load %arg0[%c5_135, %c0_136, %c0_137] : memref<12x32x16xf32, #tpu.memory_space<vmem>>, vector<1x32x16xf32>
    %178 = vector.shape_cast %177 : vector<1x32x16xf32> to vector<32x16xf32>
    %c5_138 = arith.constant 5 : index
    %c2_139 = arith.constant 2 : index
    %179 = memref.load %arg1[%c5_138, %c2_139] : memref<12x5xf32, #tpu.memory_space<smem>>
    %180 = vector.broadcast %179 : f32 to vector<32x16xf32>
    %181 = arith.mulf %178, %180 : vector<32x16xf32>
    %182 = arith.addf %176, %181 : vector<32x16xf32>
    %c6_140 = arith.constant 6 : index
    %c0_141 = arith.constant 0 : index
    %c0_142 = arith.constant 0 : index
    %183 = vector.load %arg0[%c6_140, %c0_141, %c0_142] : memref<12x32x16xf32, #tpu.memory_space<vmem>>, vector<1x32x16xf32>
    %184 = vector.shape_cast %183 : vector<1x32x16xf32> to vector<32x16xf32>
    %c6_143 = arith.constant 6 : index
    %c2_144 = arith.constant 2 : index
    %185 = memref.load %arg1[%c6_143, %c2_144] : memref<12x5xf32, #tpu.memory_space<smem>>
    %186 = vector.broadcast %185 : f32 to vector<32x16xf32>
    %187 = arith.mulf %184, %186 : vector<32x16xf32>
    %188 = arith.addf %182, %187 : vector<32x16xf32>
    %c7_145 = arith.constant 7 : index
    %c0_146 = arith.constant 0 : index
    %c0_147 = arith.constant 0 : index
    %189 = vector.load %arg0[%c7_145, %c0_146, %c0_147] : memref<12x32x16xf32, #tpu.memory_space<vmem>>, vector<1x32x16xf32>
    %190 = vector.shape_cast %189 : vector<1x32x16xf32> to vector<32x16xf32>
    %c7_148 = arith.constant 7 : index
    %c2_149 = arith.constant 2 : index
    %191 = memref.load %arg1[%c7_148, %c2_149] : memref<12x5xf32, #tpu.memory_space<smem>>
    %192 = vector.broadcast %191 : f32 to vector<32x16xf32>
    %193 = arith.mulf %190, %192 : vector<32x16xf32>
    %194 = arith.addf %188, %193 : vector<32x16xf32>
    %c8_150 = arith.constant 8 : index
    %c0_151 = arith.constant 0 : index
    %c0_152 = arith.constant 0 : index
    %195 = vector.load %arg0[%c8_150, %c0_151, %c0_152] : memref<12x32x16xf32, #tpu.memory_space<vmem>>, vector<1x32x16xf32>
    %196 = vector.shape_cast %195 : vector<1x32x16xf32> to vector<32x16xf32>
    %c8_153 = arith.constant 8 : index
    %c2_154 = arith.constant 2 : index
    %197 = memref.load %arg1[%c8_153, %c2_154] : memref<12x5xf32, #tpu.memory_space<smem>>
    %198 = vector.broadcast %197 : f32 to vector<32x16xf32>
    %199 = arith.mulf %196, %198 : vector<32x16xf32>
    %200 = arith.addf %194, %199 : vector<32x16xf32>
    %c9_155 = arith.constant 9 : index
    %c0_156 = arith.constant 0 : index
    %c0_157 = arith.constant 0 : index
    %201 = vector.load %arg0[%c9_155, %c0_156, %c0_157] : memref<12x32x16xf32, #tpu.memory_space<vmem>>, vector<1x32x16xf32>
    %202 = vector.shape_cast %201 : vector<1x32x16xf32> to vector<32x16xf32>
    %c9_158 = arith.constant 9 : index
    %c2_159 = arith.constant 2 : index
    %203 = memref.load %arg1[%c9_158, %c2_159] : memref<12x5xf32, #tpu.memory_space<smem>>
    %204 = vector.broadcast %203 : f32 to vector<32x16xf32>
    %205 = arith.mulf %202, %204 : vector<32x16xf32>
    %206 = arith.addf %200, %205 : vector<32x16xf32>
    %c10_160 = arith.constant 10 : index
    %c0_161 = arith.constant 0 : index
    %c0_162 = arith.constant 0 : index
    %207 = vector.load %arg0[%c10_160, %c0_161, %c0_162] : memref<12x32x16xf32, #tpu.memory_space<vmem>>, vector<1x32x16xf32>
    %208 = vector.shape_cast %207 : vector<1x32x16xf32> to vector<32x16xf32>
    %c10_163 = arith.constant 10 : index
    %c2_164 = arith.constant 2 : index
    %209 = memref.load %arg1[%c10_163, %c2_164] : memref<12x5xf32, #tpu.memory_space<smem>>
    %210 = vector.broadcast %209 : f32 to vector<32x16xf32>
    %211 = arith.mulf %208, %210 : vector<32x16xf32>
    %212 = arith.addf %206, %211 : vector<32x16xf32>
    %c11_165 = arith.constant 11 : index
    %c0_166 = arith.constant 0 : index
    %c0_167 = arith.constant 0 : index
    %213 = vector.load %arg0[%c11_165, %c0_166, %c0_167] : memref<12x32x16xf32, #tpu.memory_space<vmem>>, vector<1x32x16xf32>
    %214 = vector.shape_cast %213 : vector<1x32x16xf32> to vector<32x16xf32>
    %c11_168 = arith.constant 11 : index
    %c2_169 = arith.constant 2 : index
    %215 = memref.load %arg1[%c11_168, %c2_169] : memref<12x5xf32, #tpu.memory_space<smem>>
    %216 = vector.broadcast %215 : f32 to vector<32x16xf32>
    %217 = arith.mulf %214, %216 : vector<32x16xf32>
    %218 = arith.addf %212, %217 : vector<32x16xf32>
    %c2_170 = arith.constant 2 : index
    %219 = memref.load %arg2[%c2_170] : memref<5xf32, #tpu.memory_space<smem>>
    %220 = vector.broadcast %219 : f32 to vector<32x16xf32>
    %221 = arith.addf %218, %220 : vector<32x16xf32>
    %c0_171 = arith.constant 0 : index
    %c0_172 = arith.constant 0 : index
    %c0_173 = arith.constant 0 : index
    %222 = vector.load %arg0[%c0_171, %c0_172, %c0_173] : memref<12x32x16xf32, #tpu.memory_space<vmem>>, vector<1x32x16xf32>
    %223 = vector.shape_cast %222 : vector<1x32x16xf32> to vector<32x16xf32>
    %c0_174 = arith.constant 0 : index
    %c3_175 = arith.constant 3 : index
    %224 = memref.load %arg1[%c0_174, %c3_175] : memref<12x5xf32, #tpu.memory_space<smem>>
    %225 = vector.broadcast %224 : f32 to vector<32x16xf32>
    %226 = arith.mulf %223, %225 : vector<32x16xf32>
    %c1_176 = arith.constant 1 : index
    %c0_177 = arith.constant 0 : index
    %c0_178 = arith.constant 0 : index
    %227 = vector.load %arg0[%c1_176, %c0_177, %c0_178] : memref<12x32x16xf32, #tpu.memory_space<vmem>>, vector<1x32x16xf32>
    %228 = vector.shape_cast %227 : vector<1x32x16xf32> to vector<32x16xf32>
    %c1_179 = arith.constant 1 : index
    %c3_180 = arith.constant 3 : index
    %229 = memref.load %arg1[%c1_179, %c3_180] : memref<12x5xf32, #tpu.memory_space<smem>>
    %230 = vector.broadcast %229 : f32 to vector<32x16xf32>
    %231 = arith.mulf %228, %230 : vector<32x16xf32>
    %232 = arith.addf %226, %231 : vector<32x16xf32>
    %c2_181 = arith.constant 2 : index
    %c0_182 = arith.constant 0 : index
    %c0_183 = arith.constant 0 : index
    %233 = vector.load %arg0[%c2_181, %c0_182, %c0_183] : memref<12x32x16xf32, #tpu.memory_space<vmem>>, vector<1x32x16xf32>
    %234 = vector.shape_cast %233 : vector<1x32x16xf32> to vector<32x16xf32>
    %c2_184 = arith.constant 2 : index
    %c3_185 = arith.constant 3 : index
    %235 = memref.load %arg1[%c2_184, %c3_185] : memref<12x5xf32, #tpu.memory_space<smem>>
    %236 = vector.broadcast %235 : f32 to vector<32x16xf32>
    %237 = arith.mulf %234, %236 : vector<32x16xf32>
    %238 = arith.addf %232, %237 : vector<32x16xf32>
    %c3_186 = arith.constant 3 : index
    %c0_187 = arith.constant 0 : index
    %c0_188 = arith.constant 0 : index
    %239 = vector.load %arg0[%c3_186, %c0_187, %c0_188] : memref<12x32x16xf32, #tpu.memory_space<vmem>>, vector<1x32x16xf32>
    %240 = vector.shape_cast %239 : vector<1x32x16xf32> to vector<32x16xf32>
    %c3_189 = arith.constant 3 : index
    %c3_190 = arith.constant 3 : index
    %241 = memref.load %arg1[%c3_189, %c3_190] : memref<12x5xf32, #tpu.memory_space<smem>>
    %242 = vector.broadcast %241 : f32 to vector<32x16xf32>
    %243 = arith.mulf %240, %242 : vector<32x16xf32>
    %244 = arith.addf %238, %243 : vector<32x16xf32>
    %c4_191 = arith.constant 4 : index
    %c0_192 = arith.constant 0 : index
    %c0_193 = arith.constant 0 : index
    %245 = vector.load %arg0[%c4_191, %c0_192, %c0_193] : memref<12x32x16xf32, #tpu.memory_space<vmem>>, vector<1x32x16xf32>
    %246 = vector.shape_cast %245 : vector<1x32x16xf32> to vector<32x16xf32>
    %c4_194 = arith.constant 4 : index
    %c3_195 = arith.constant 3 : index
    %247 = memref.load %arg1[%c4_194, %c3_195] : memref<12x5xf32, #tpu.memory_space<smem>>
    %248 = vector.broadcast %247 : f32 to vector<32x16xf32>
    %249 = arith.mulf %246, %248 : vector<32x16xf32>
    %250 = arith.addf %244, %249 : vector<32x16xf32>
    %c5_196 = arith.constant 5 : index
    %c0_197 = arith.constant 0 : index
    %c0_198 = arith.constant 0 : index
    %251 = vector.load %arg0[%c5_196, %c0_197, %c0_198] : memref<12x32x16xf32, #tpu.memory_space<vmem>>, vector<1x32x16xf32>
    %252 = vector.shape_cast %251 : vector<1x32x16xf32> to vector<32x16xf32>
    %c5_199 = arith.constant 5 : index
    %c3_200 = arith.constant 3 : index
    %253 = memref.load %arg1[%c5_199, %c3_200] : memref<12x5xf32, #tpu.memory_space<smem>>
    %254 = vector.broadcast %253 : f32 to vector<32x16xf32>
    %255 = arith.mulf %252, %254 : vector<32x16xf32>
    %256 = arith.addf %250, %255 : vector<32x16xf32>
    %c6_201 = arith.constant 6 : index
    %c0_202 = arith.constant 0 : index
    %c0_203 = arith.constant 0 : index
    %257 = vector.load %arg0[%c6_201, %c0_202, %c0_203] : memref<12x32x16xf32, #tpu.memory_space<vmem>>, vector<1x32x16xf32>
    %258 = vector.shape_cast %257 : vector<1x32x16xf32> to vector<32x16xf32>
    %c6_204 = arith.constant 6 : index
    %c3_205 = arith.constant 3 : index
    %259 = memref.load %arg1[%c6_204, %c3_205] : memref<12x5xf32, #tpu.memory_space<smem>>
    %260 = vector.broadcast %259 : f32 to vector<32x16xf32>
    %261 = arith.mulf %258, %260 : vector<32x16xf32>
    %262 = arith.addf %256, %261 : vector<32x16xf32>
    %c7_206 = arith.constant 7 : index
    %c0_207 = arith.constant 0 : index
    %c0_208 = arith.constant 0 : index
    %263 = vector.load %arg0[%c7_206, %c0_207, %c0_208] : memref<12x32x16xf32, #tpu.memory_space<vmem>>, vector<1x32x16xf32>
    %264 = vector.shape_cast %263 : vector<1x32x16xf32> to vector<32x16xf32>
    %c7_209 = arith.constant 7 : index
    %c3_210 = arith.constant 3 : index
    %265 = memref.load %arg1[%c7_209, %c3_210] : memref<12x5xf32, #tpu.memory_space<smem>>
    %266 = vector.broadcast %265 : f32 to vector<32x16xf32>
    %267 = arith.mulf %264, %266 : vector<32x16xf32>
    %268 = arith.addf %262, %267 : vector<32x16xf32>
    %c8_211 = arith.constant 8 : index
    %c0_212 = arith.constant 0 : index
    %c0_213 = arith.constant 0 : index
    %269 = vector.load %arg0[%c8_211, %c0_212, %c0_213] : memref<12x32x16xf32, #tpu.memory_space<vmem>>, vector<1x32x16xf32>
    %270 = vector.shape_cast %269 : vector<1x32x16xf32> to vector<32x16xf32>
    %c8_214 = arith.constant 8 : index
    %c3_215 = arith.constant 3 : index
    %271 = memref.load %arg1[%c8_214, %c3_215] : memref<12x5xf32, #tpu.memory_space<smem>>
    %272 = vector.broadcast %271 : f32 to vector<32x16xf32>
    %273 = arith.mulf %270, %272 : vector<32x16xf32>
    %274 = arith.addf %268, %273 : vector<32x16xf32>
    %c9_216 = arith.constant 9 : index
    %c0_217 = arith.constant 0 : index
    %c0_218 = arith.constant 0 : index
    %275 = vector.load %arg0[%c9_216, %c0_217, %c0_218] : memref<12x32x16xf32, #tpu.memory_space<vmem>>, vector<1x32x16xf32>
    %276 = vector.shape_cast %275 : vector<1x32x16xf32> to vector<32x16xf32>
    %c9_219 = arith.constant 9 : index
    %c3_220 = arith.constant 3 : index
    %277 = memref.load %arg1[%c9_219, %c3_220] : memref<12x5xf32, #tpu.memory_space<smem>>
    %278 = vector.broadcast %277 : f32 to vector<32x16xf32>
    %279 = arith.mulf %276, %278 : vector<32x16xf32>
    %280 = arith.addf %274, %279 : vector<32x16xf32>
    %c10_221 = arith.constant 10 : index
    %c0_222 = arith.constant 0 : index
    %c0_223 = arith.constant 0 : index
    %281 = vector.load %arg0[%c10_221, %c0_222, %c0_223] : memref<12x32x16xf32, #tpu.memory_space<vmem>>, vector<1x32x16xf32>
    %282 = vector.shape_cast %281 : vector<1x32x16xf32> to vector<32x16xf32>
    %c10_224 = arith.constant 10 : index
    %c3_225 = arith.constant 3 : index
    %283 = memref.load %arg1[%c10_224, %c3_225] : memref<12x5xf32, #tpu.memory_space<smem>>
    %284 = vector.broadcast %283 : f32 to vector<32x16xf32>
    %285 = arith.mulf %282, %284 : vector<32x16xf32>
    %286 = arith.addf %280, %285 : vector<32x16xf32>
    %c11_226 = arith.constant 11 : index
    %c0_227 = arith.constant 0 : index
    %c0_228 = arith.constant 0 : index
    %287 = vector.load %arg0[%c11_226, %c0_227, %c0_228] : memref<12x32x16xf32, #tpu.memory_space<vmem>>, vector<1x32x16xf32>
    %288 = vector.shape_cast %287 : vector<1x32x16xf32> to vector<32x16xf32>
    %c11_229 = arith.constant 11 : index
    %c3_230 = arith.constant 3 : index
    %289 = memref.load %arg1[%c11_229, %c3_230] : memref<12x5xf32, #tpu.memory_space<smem>>
    %290 = vector.broadcast %289 : f32 to vector<32x16xf32>
    %291 = arith.mulf %288, %290 : vector<32x16xf32>
    %292 = arith.addf %286, %291 : vector<32x16xf32>
    %c3_231 = arith.constant 3 : index
    %293 = memref.load %arg2[%c3_231] : memref<5xf32, #tpu.memory_space<smem>>
    %294 = vector.broadcast %293 : f32 to vector<32x16xf32>
    %295 = arith.addf %292, %294 : vector<32x16xf32>
    %c0_232 = arith.constant 0 : index
    %c0_233 = arith.constant 0 : index
    %c0_234 = arith.constant 0 : index
    %296 = vector.load %arg0[%c0_232, %c0_233, %c0_234] : memref<12x32x16xf32, #tpu.memory_space<vmem>>, vector<1x32x16xf32>
    %297 = vector.shape_cast %296 : vector<1x32x16xf32> to vector<32x16xf32>
    %c0_235 = arith.constant 0 : index
    %c4_236 = arith.constant 4 : index
    %298 = memref.load %arg1[%c0_235, %c4_236] : memref<12x5xf32, #tpu.memory_space<smem>>
    %299 = vector.broadcast %298 : f32 to vector<32x16xf32>
    %300 = arith.mulf %297, %299 : vector<32x16xf32>
    %c1_237 = arith.constant 1 : index
    %c0_238 = arith.constant 0 : index
    %c0_239 = arith.constant 0 : index
    %301 = vector.load %arg0[%c1_237, %c0_238, %c0_239] : memref<12x32x16xf32, #tpu.memory_space<vmem>>, vector<1x32x16xf32>
    %302 = vector.shape_cast %301 : vector<1x32x16xf32> to vector<32x16xf32>
    %c1_240 = arith.constant 1 : index
    %c4_241 = arith.constant 4 : index
    %303 = memref.load %arg1[%c1_240, %c4_241] : memref<12x5xf32, #tpu.memory_space<smem>>
    %304 = vector.broadcast %303 : f32 to vector<32x16xf32>
    %305 = arith.mulf %302, %304 : vector<32x16xf32>
    %306 = arith.addf %300, %305 : vector<32x16xf32>
    %c2_242 = arith.constant 2 : index
    %c0_243 = arith.constant 0 : index
    %c0_244 = arith.constant 0 : index
    %307 = vector.load %arg0[%c2_242, %c0_243, %c0_244] : memref<12x32x16xf32, #tpu.memory_space<vmem>>, vector<1x32x16xf32>
    %308 = vector.shape_cast %307 : vector<1x32x16xf32> to vector<32x16xf32>
    %c2_245 = arith.constant 2 : index
    %c4_246 = arith.constant 4 : index
    %309 = memref.load %arg1[%c2_245, %c4_246] : memref<12x5xf32, #tpu.memory_space<smem>>
    %310 = vector.broadcast %309 : f32 to vector<32x16xf32>
    %311 = arith.mulf %308, %310 : vector<32x16xf32>
    %312 = arith.addf %306, %311 : vector<32x16xf32>
    %c3_247 = arith.constant 3 : index
    %c0_248 = arith.constant 0 : index
    %c0_249 = arith.constant 0 : index
    %313 = vector.load %arg0[%c3_247, %c0_248, %c0_249] : memref<12x32x16xf32, #tpu.memory_space<vmem>>, vector<1x32x16xf32>
    %314 = vector.shape_cast %313 : vector<1x32x16xf32> to vector<32x16xf32>
    %c3_250 = arith.constant 3 : index
    %c4_251 = arith.constant 4 : index
    %315 = memref.load %arg1[%c3_250, %c4_251] : memref<12x5xf32, #tpu.memory_space<smem>>
    %316 = vector.broadcast %315 : f32 to vector<32x16xf32>
    %317 = arith.mulf %314, %316 : vector<32x16xf32>
    %318 = arith.addf %312, %317 : vector<32x16xf32>
    %c4_252 = arith.constant 4 : index
    %c0_253 = arith.constant 0 : index
    %c0_254 = arith.constant 0 : index
    %319 = vector.load %arg0[%c4_252, %c0_253, %c0_254] : memref<12x32x16xf32, #tpu.memory_space<vmem>>, vector<1x32x16xf32>
    %320 = vector.shape_cast %319 : vector<1x32x16xf32> to vector<32x16xf32>
    %c4_255 = arith.constant 4 : index
    %c4_256 = arith.constant 4 : index
    %321 = memref.load %arg1[%c4_255, %c4_256] : memref<12x5xf32, #tpu.memory_space<smem>>
    %322 = vector.broadcast %321 : f32 to vector<32x16xf32>
    %323 = arith.mulf %320, %322 : vector<32x16xf32>
    %324 = arith.addf %318, %323 : vector<32x16xf32>
    %c5_257 = arith.constant 5 : index
    %c0_258 = arith.constant 0 : index
    %c0_259 = arith.constant 0 : index
    %325 = vector.load %arg0[%c5_257, %c0_258, %c0_259] : memref<12x32x16xf32, #tpu.memory_space<vmem>>, vector<1x32x16xf32>
    %326 = vector.shape_cast %325 : vector<1x32x16xf32> to vector<32x16xf32>
    %c5_260 = arith.constant 5 : index
    %c4_261 = arith.constant 4 : index
    %327 = memref.load %arg1[%c5_260, %c4_261] : memref<12x5xf32, #tpu.memory_space<smem>>
    %328 = vector.broadcast %327 : f32 to vector<32x16xf32>
    %329 = arith.mulf %326, %328 : vector<32x16xf32>
    %330 = arith.addf %324, %329 : vector<32x16xf32>
    %c6_262 = arith.constant 6 : index
    %c0_263 = arith.constant 0 : index
    %c0_264 = arith.constant 0 : index
    %331 = vector.load %arg0[%c6_262, %c0_263, %c0_264] : memref<12x32x16xf32, #tpu.memory_space<vmem>>, vector<1x32x16xf32>
    %332 = vector.shape_cast %331 : vector<1x32x16xf32> to vector<32x16xf32>
    %c6_265 = arith.constant 6 : index
    %c4_266 = arith.constant 4 : index
    %333 = memref.load %arg1[%c6_265, %c4_266] : memref<12x5xf32, #tpu.memory_space<smem>>
    %334 = vector.broadcast %333 : f32 to vector<32x16xf32>
    %335 = arith.mulf %332, %334 : vector<32x16xf32>
    %336 = arith.addf %330, %335 : vector<32x16xf32>
    %c7_267 = arith.constant 7 : index
    %c0_268 = arith.constant 0 : index
    %c0_269 = arith.constant 0 : index
    %337 = vector.load %arg0[%c7_267, %c0_268, %c0_269] : memref<12x32x16xf32, #tpu.memory_space<vmem>>, vector<1x32x16xf32>
    %338 = vector.shape_cast %337 : vector<1x32x16xf32> to vector<32x16xf32>
    %c7_270 = arith.constant 7 : index
    %c4_271 = arith.constant 4 : index
    %339 = memref.load %arg1[%c7_270, %c4_271] : memref<12x5xf32, #tpu.memory_space<smem>>
    %340 = vector.broadcast %339 : f32 to vector<32x16xf32>
    %341 = arith.mulf %338, %340 : vector<32x16xf32>
    %342 = arith.addf %336, %341 : vector<32x16xf32>
    %c8_272 = arith.constant 8 : index
    %c0_273 = arith.constant 0 : index
    %c0_274 = arith.constant 0 : index
    %343 = vector.load %arg0[%c8_272, %c0_273, %c0_274] : memref<12x32x16xf32, #tpu.memory_space<vmem>>, vector<1x32x16xf32>
    %344 = vector.shape_cast %343 : vector<1x32x16xf32> to vector<32x16xf32>
    %c8_275 = arith.constant 8 : index
    %c4_276 = arith.constant 4 : index
    %345 = memref.load %arg1[%c8_275, %c4_276] : memref<12x5xf32, #tpu.memory_space<smem>>
    %346 = vector.broadcast %345 : f32 to vector<32x16xf32>
    %347 = arith.mulf %344, %346 : vector<32x16xf32>
    %348 = arith.addf %342, %347 : vector<32x16xf32>
    %c9_277 = arith.constant 9 : index
    %c0_278 = arith.constant 0 : index
    %c0_279 = arith.constant 0 : index
    %349 = vector.load %arg0[%c9_277, %c0_278, %c0_279] : memref<12x32x16xf32, #tpu.memory_space<vmem>>, vector<1x32x16xf32>
    %350 = vector.shape_cast %349 : vector<1x32x16xf32> to vector<32x16xf32>
    %c9_280 = arith.constant 9 : index
    %c4_281 = arith.constant 4 : index
    %351 = memref.load %arg1[%c9_280, %c4_281] : memref<12x5xf32, #tpu.memory_space<smem>>
    %352 = vector.broadcast %351 : f32 to vector<32x16xf32>
    %353 = arith.mulf %350, %352 : vector<32x16xf32>
    %354 = arith.addf %348, %353 : vector<32x16xf32>
    %c10_282 = arith.constant 10 : index
    %c0_283 = arith.constant 0 : index
    %c0_284 = arith.constant 0 : index
    %355 = vector.load %arg0[%c10_282, %c0_283, %c0_284] : memref<12x32x16xf32, #tpu.memory_space<vmem>>, vector<1x32x16xf32>
    %356 = vector.shape_cast %355 : vector<1x32x16xf32> to vector<32x16xf32>
    %c10_285 = arith.constant 10 : index
    %c4_286 = arith.constant 4 : index
    %357 = memref.load %arg1[%c10_285, %c4_286] : memref<12x5xf32, #tpu.memory_space<smem>>
    %358 = vector.broadcast %357 : f32 to vector<32x16xf32>
    %359 = arith.mulf %356, %358 : vector<32x16xf32>
    %360 = arith.addf %354, %359 : vector<32x16xf32>
    %c11_287 = arith.constant 11 : index
    %c0_288 = arith.constant 0 : index
    %c0_289 = arith.constant 0 : index
    %361 = vector.load %arg0[%c11_287, %c0_288, %c0_289] : memref<12x32x16xf32, #tpu.memory_space<vmem>>, vector<1x32x16xf32>
    %362 = vector.shape_cast %361 : vector<1x32x16xf32> to vector<32x16xf32>
    %c11_290 = arith.constant 11 : index
    %c4_291 = arith.constant 4 : index
    %363 = memref.load %arg1[%c11_290, %c4_291] : memref<12x5xf32, #tpu.memory_space<smem>>
    %364 = vector.broadcast %363 : f32 to vector<32x16xf32>
    %365 = arith.mulf %362, %364 : vector<32x16xf32>
    %366 = arith.addf %360, %365 : vector<32x16xf32>
    %c4_292 = arith.constant 4 : index
    %367 = memref.load %arg2[%c4_292] : memref<5xf32, #tpu.memory_space<smem>>
    %368 = vector.broadcast %367 : f32 to vector<32x16xf32>
    %369 = arith.addf %366, %368 : vector<32x16xf32>
    %370 = tpu.concatenate %73, %147, %221, %295, %369 in 0 : vector<32x16xf32>, vector<32x16xf32>, vector<32x16xf32>, vector<32x16xf32>, vector<32x16xf32> -> vector<160x16xf32>
    %371 = arith.truncf %370 : vector<160x16xf32> to vector<160x16xbf16>
    %c0_293 = arith.constant 0 : index
    %c0_294 = arith.constant 0 : index
    %372 = vector.load %arg3[%c0_293, %c0_294] : memref<16x128xbf16, #tpu.memory_space<vmem>>, vector<16x128xbf16>
    %cst = arith.constant dense<0.000000e+00> : vector<160x128xf32>
    %373 = tpu.matmul %371, %372, %cst {dimension_numbers = #tpu.dot_dimension_numbers<[1], [0], [0], [1], [0, 0, 1, 1], [], []>} : vector<160x16xbf16>, vector<16x128xbf16>, vector<160x128xf32> -> vector<160x128xf32>
    %374 = arith.truncf %373 : vector<160x128xf32> to vector<160x128xbf16>
    %c0_295 = arith.constant 0 : index
    %c0_296 = arith.constant 0 : index
    %375 = vector.load %arg4[%c0_295, %c0_296] : memref<32x16xbf16, #tpu.memory_space<vmem>>, vector<32x16xbf16>
    %376 = vector.extract_strided_slice %374 {offsets = [0, 0], sizes = [16, 128], strides = [1, 1]} : vector<160x128xbf16> to vector<16x128xbf16>
    %cst_297 = arith.constant dense<0.000000e+00> : vector<32x128xf32>
    %377 = tpu.matmul %375, %376, %cst_297 {dimension_numbers = #tpu.dot_dimension_numbers<[1], [0], [0], [1], [0, 0, 1, 1], [], []>} : vector<32x16xbf16>, vector<16x128xbf16>, vector<32x128xf32> -> vector<32x128xf32>
    %c0_298 = arith.constant 0 : index
    %c0_299 = arith.constant 0 : index
    %c0_300 = arith.constant 0 : index
    %c0_301 = arith.constant 0 : index
    %378 = vector.load %arg5[%c0_298, %c0_299, %c0_300, %c0_301] : memref<2x5x32x128xf32, #tpu.memory_space<vmem>>, vector<1x1x32x128xf32>
    %379 = vector.shape_cast %378 : vector<1x1x32x128xf32> to vector<32x128xf32>
    %380 = vector.shape_cast %377 : vector<32x128xf32> to vector<1x1x32x128xf32>
    tpu.vector_store %arg5[%c0_298, %c0_299, %c0_300, %c0_301], %380 {strides = array<i32>} : memref<2x5x32x128xf32, #tpu.memory_space<vmem>>, vector<1x1x32x128xf32>,
    %381 = vector.extract_strided_slice %374 {offsets = [16, 0], sizes = [16, 128], strides = [1, 1]} : vector<160x128xbf16> to vector<16x128xbf16>
    %cst_302 = arith.constant dense<0.000000e+00> : vector<32x128xf32>
    %382 = tpu.matmul %375, %381, %cst_302 {dimension_numbers = #tpu.dot_dimension_numbers<[1], [0], [0], [1], [0, 0, 1, 1], [], []>} : vector<32x16xbf16>, vector<16x128xbf16>, vector<32x128xf32> -> vector<32x128xf32>
    %c1_303 = arith.constant 1 : index
    %c0_304 = arith.constant 0 : index
    %c0_305 = arith.constant 0 : index
    %c0_306 = arith.constant 0 : index
    %383 = vector.load %arg5[%c1_303, %c0_304, %c0_305, %c0_306] : memref<2x5x32x128xf32, #tpu.memory_space<vmem>>, vector<1x1x32x128xf32>
    %384 = vector.shape_cast %383 : vector<1x1x32x128xf32> to vector<32x128xf32>
    %385 = vector.shape_cast %382 : vector<32x128xf32> to vector<1x1x32x128xf32>
    tpu.vector_store %arg5[%c1_303, %c0_304, %c0_305, %c0_306], %385 {strides = array<i32>} : memref<2x5x32x128xf32, #tpu.memory_space<vmem>>, vector<1x1x32x128xf32>,
    %386 = vector.extract_strided_slice %374 {offsets = [32, 0], sizes = [16, 128], strides = [1, 1]} : vector<160x128xbf16> to vector<16x128xbf16>
    %cst_307 = arith.constant dense<0.000000e+00> : vector<32x128xf32>
    %387 = tpu.matmul %375, %386, %cst_307 {dimension_numbers = #tpu.dot_dimension_numbers<[1], [0], [0], [1], [0, 0, 1, 1], [], []>} : vector<32x16xbf16>, vector<16x128xbf16>, vector<32x128xf32> -> vector<32x128xf32>
    %c0_308 = arith.constant 0 : index
    %c1_309 = arith.constant 1 : index
    %c0_310 = arith.constant 0 : index
    %c0_311 = arith.constant 0 : index
    %388 = vector.load %arg5[%c0_308, %c1_309, %c0_310, %c0_311] : memref<2x5x32x128xf32, #tpu.memory_space<vmem>>, vector<1x1x32x128xf32>
    %389 = vector.shape_cast %388 : vector<1x1x32x128xf32> to vector<32x128xf32>
    %390 = vector.shape_cast %387 : vector<32x128xf32> to vector<1x1x32x128xf32>
    tpu.vector_store %arg5[%c0_308, %c1_309, %c0_310, %c0_311], %390 {strides = array<i32>} : memref<2x5x32x128xf32, #tpu.memory_space<vmem>>, vector<1x1x32x128xf32>,
    %391 = vector.extract_strided_slice %374 {offsets = [48, 0], sizes = [16, 128], strides = [1, 1]} : vector<160x128xbf16> to vector<16x128xbf16>
    %cst_312 = arith.constant dense<0.000000e+00> : vector<32x128xf32>
    %392 = tpu.matmul %375, %391, %cst_312 {dimension_numbers = #tpu.dot_dimension_numbers<[1], [0], [0], [1], [0, 0, 1, 1], [], []>} : vector<32x16xbf16>, vector<16x128xbf16>, vector<32x128xf32> -> vector<32x128xf32>
    %c1_313 = arith.constant 1 : index
    %c1_314 = arith.constant 1 : index
    %c0_315 = arith.constant 0 : index
    %c0_316 = arith.constant 0 : index
    %393 = vector.load %arg5[%c1_313, %c1_314, %c0_315, %c0_316] : memref<2x5x32x128xf32, #tpu.memory_space<vmem>>, vector<1x1x32x128xf32>
    %394 = vector.shape_cast %393 : vector<1x1x32x128xf32> to vector<32x128xf32>
    %395 = vector.shape_cast %392 : vector<32x128xf32> to vector<1x1x32x128xf32>
    tpu.vector_store %arg5[%c1_313, %c1_314, %c0_315, %c0_316], %395 {strides = array<i32>} : memref<2x5x32x128xf32, #tpu.memory_space<vmem>>, vector<1x1x32x128xf32>,
    %396 = vector.extract_strided_slice %374 {offsets = [64, 0], sizes = [16, 128], strides = [1, 1]} : vector<160x128xbf16> to vector<16x128xbf16>
    %cst_317 = arith.constant dense<0.000000e+00> : vector<32x128xf32>
    %397 = tpu.matmul %375, %396, %cst_317 {dimension_numbers = #tpu.dot_dimension_numbers<[1], [0], [0], [1], [0, 0, 1, 1], [], []>} : vector<32x16xbf16>, vector<16x128xbf16>, vector<32x128xf32> -> vector<32x128xf32>
    %c0_318 = arith.constant 0 : index
    %c2_319 = arith.constant 2 : index
    %c0_320 = arith.constant 0 : index
    %c0_321 = arith.constant 0 : index
    %398 = vector.load %arg5[%c0_318, %c2_319, %c0_320, %c0_321] : memref<2x5x32x128xf32, #tpu.memory_space<vmem>>, vector<1x1x32x128xf32>
    %399 = vector.shape_cast %398 : vector<1x1x32x128xf32> to vector<32x128xf32>
    %400 = vector.shape_cast %397 : vector<32x128xf32> to vector<1x1x32x128xf32>
    tpu.vector_store %arg5[%c0_318, %c2_319, %c0_320, %c0_321], %400 {strides = array<i32>} : memref<2x5x32x128xf32, #tpu.memory_space<vmem>>, vector<1x1x32x128xf32>,
    %401 = vector.extract_strided_slice %374 {offsets = [80, 0], sizes = [16, 128], strides = [1, 1]} : vector<160x128xbf16> to vector<16x128xbf16>
    %cst_322 = arith.constant dense<0.000000e+00> : vector<32x128xf32>
    %402 = tpu.matmul %375, %401, %cst_322 {dimension_numbers = #tpu.dot_dimension_numbers<[1], [0], [0], [1], [0, 0, 1, 1], [], []>} : vector<32x16xbf16>, vector<16x128xbf16>, vector<32x128xf32> -> vector<32x128xf32>
    %c1_323 = arith.constant 1 : index
    %c2_324 = arith.constant 2 : index
    %c0_325 = arith.constant 0 : index
    %c0_326 = arith.constant 0 : index
    %403 = vector.load %arg5[%c1_323, %c2_324, %c0_325, %c0_326] : memref<2x5x32x128xf32, #tpu.memory_space<vmem>>, vector<1x1x32x128xf32>
    %404 = vector.shape_cast %403 : vector<1x1x32x128xf32> to vector<32x128xf32>
    %405 = vector.shape_cast %402 : vector<32x128xf32> to vector<1x1x32x128xf32>
    tpu.vector_store %arg5[%c1_323, %c2_324, %c0_325, %c0_326], %405 {strides = array<i32>} : memref<2x5x32x128xf32, #tpu.memory_space<vmem>>, vector<1x1x32x128xf32>,
    %406 = vector.extract_strided_slice %374 {offsets = [96, 0], sizes = [16, 128], strides = [1, 1]} : vector<160x128xbf16> to vector<16x128xbf16>
    %cst_327 = arith.constant dense<0.000000e+00> : vector<32x128xf32>
    %407 = tpu.matmul %375, %406, %cst_327 {dimension_numbers = #tpu.dot_dimension_numbers<[1], [0], [0], [1], [0, 0, 1, 1], [], []>} : vector<32x16xbf16>, vector<16x128xbf16>, vector<32x128xf32> -> vector<32x128xf32>
    %c0_328 = arith.constant 0 : index
    %c3_329 = arith.constant 3 : index
    %c0_330 = arith.constant 0 : index
    %c0_331 = arith.constant 0 : index
    %408 = vector.load %arg5[%c0_328, %c3_329, %c0_330, %c0_331] : memref<2x5x32x128xf32, #tpu.memory_space<vmem>>, vector<1x1x32x128xf32>
    %409 = vector.shape_cast %408 : vector<1x1x32x128xf32> to vector<32x128xf32>
    %410 = vector.shape_cast %407 : vector<32x128xf32> to vector<1x1x32x128xf32>
    tpu.vector_store %arg5[%c0_328, %c3_329, %c0_330, %c0_331], %410 {strides = array<i32>} : memref<2x5x32x128xf32, #tpu.memory_space<vmem>>, vector<1x1x32x128xf32>,
    %411 = vector.extract_strided_slice %374 {offsets = [112, 0], sizes = [16, 128], strides = [1, 1]} : vector<160x128xbf16> to vector<16x128xbf16>
    %cst_332 = arith.constant dense<0.000000e+00> : vector<32x128xf32>
    %412 = tpu.matmul %375, %411, %cst_332 {dimension_numbers = #tpu.dot_dimension_numbers<[1], [0], [0], [1], [0, 0, 1, 1], [], []>} : vector<32x16xbf16>, vector<16x128xbf16>, vector<32x128xf32> -> vector<32x128xf32>
    %c1_333 = arith.constant 1 : index
    %c3_334 = arith.constant 3 : index
    %c0_335 = arith.constant 0 : index
    %c0_336 = arith.constant 0 : index
    %413 = vector.load %arg5[%c1_333, %c3_334, %c0_335, %c0_336] : memref<2x5x32x128xf32, #tpu.memory_space<vmem>>, vector<1x1x32x128xf32>
    %414 = vector.shape_cast %413 : vector<1x1x32x128xf32> to vector<32x128xf32>
    %415 = vector.shape_cast %412 : vector<32x128xf32> to vector<1x1x32x128xf32>
    tpu.vector_store %arg5[%c1_333, %c3_334, %c0_335, %c0_336], %415 {strides = array<i32>} : memref<2x5x32x128xf32, #tpu.memory_space<vmem>>, vector<1x1x32x128xf32>,
    %416 = vector.extract_strided_slice %374 {offsets = [128, 0], sizes = [16, 128], strides = [1, 1]} : vector<160x128xbf16> to vector<16x128xbf16>
    %cst_337 = arith.constant dense<0.000000e+00> : vector<32x128xf32>
    %417 = tpu.matmul %375, %416, %cst_337 {dimension_numbers = #tpu.dot_dimension_numbers<[1], [0], [0], [1], [0, 0, 1, 1], [], []>} : vector<32x16xbf16>, vector<16x128xbf16>, vector<32x128xf32> -> vector<32x128xf32>
    %c0_338 = arith.constant 0 : index
    %c4_339 = arith.constant 4 : index
    %c0_340 = arith.constant 0 : index
    %c0_341 = arith.constant 0 : index
    %418 = vector.load %arg5[%c0_338, %c4_339, %c0_340, %c0_341] : memref<2x5x32x128xf32, #tpu.memory_space<vmem>>, vector<1x1x32x128xf32>
    %419 = vector.shape_cast %418 : vector<1x1x32x128xf32> to vector<32x128xf32>
    %420 = vector.shape_cast %417 : vector<32x128xf32> to vector<1x1x32x128xf32>
    tpu.vector_store %arg5[%c0_338, %c4_339, %c0_340, %c0_341], %420 {strides = array<i32>} : memref<2x5x32x128xf32, #tpu.memory_space<vmem>>, vector<1x1x32x128xf32>,
    %421 = vector.extract_strided_slice %374 {offsets = [144, 0], sizes = [16, 128], strides = [1, 1]} : vector<160x128xbf16> to vector<16x128xbf16>
    %cst_342 = arith.constant dense<0.000000e+00> : vector<32x128xf32>
    %422 = tpu.matmul %375, %421, %cst_342 {dimension_numbers = #tpu.dot_dimension_numbers<[1], [0], [0], [1], [0, 0, 1, 1], [], []>} : vector<32x16xbf16>, vector<16x128xbf16>, vector<32x128xf32> -> vector<32x128xf32>
    %c1_343 = arith.constant 1 : index
    %c4_344 = arith.constant 4 : index
    %c0_345 = arith.constant 0 : index
    %c0_346 = arith.constant 0 : index
    %423 = vector.load %arg5[%c1_343, %c4_344, %c0_345, %c0_346] : memref<2x5x32x128xf32, #tpu.memory_space<vmem>>, vector<1x1x32x128xf32>
    %424 = vector.shape_cast %423 : vector<1x1x32x128xf32> to vector<32x128xf32>
    %425 = vector.shape_cast %422 : vector<32x128xf32> to vector<1x1x32x128xf32>
    tpu.vector_store %arg5[%c1_343, %c4_344, %c0_345, %c0_346], %425 {strides = array<i32>} : memref<2x5x32x128xf32, #tpu.memory_space<vmem>>, vector<1x1x32x128xf32>,
    return
  }
}

</mosaic_0001>

<bundles_post_ra>
// kernel: seg_decoder_forward.1
= control target key start
LH: loop header
LB: loop body
LE: loop exit
PB: predicated region body
PF: predicated region fallthrough
CT: control target
= control target key end

     0   :  { %10 = vsyncpa [#allocation4], 0  ;;  %s3049_s0 = inlined_call_operand.vmem [shape: f32[12,32,16], index: 0, kind: input, shape index: {}]   ;;  %s3050_s1 = inlined_call_operand.vmem [shape: f32[12,5], index: 1, kind: input, shape index: {}]   ;;  %s3051_s2 = inlined_call_operand.vmem [shape: f32[5], index: 2, kind: input, shape index: {}]   ;;  %s3052_s3 = inlined_call_operand.vmem [shape: bf16[16,128], index: 3, kind: input, shape index: {}]   ;;  %s3053_s4 = inlined_call_operand.vmem [shape: bf16[32,16], index: 4, kind: input, shape index: {}]   ;;  %s3054_s5 = inlined_call_operand.hbm [shape: f32[2,5,32,128], index: 5, kind: output, shape index: {}]  }
   0x1   :  { %11 = vsyncpa [#allocation6], 0 }
   0x2   :  { %12 = vsyncpa [#allocation3], 0  ;;  %s20_s20 = sshll.u32 %s3050_s1, 4  ;;  %s33_s23 = sshll.u32 %s3051_s2, 4  ;;  %s21_s20 = int_to_ptr.vmem [resolvable:$true] %s20_s20  ;;  %s34_s23 = int_to_ptr.vmem [resolvable:$true] %s33_s23 }
   0x3   :  { %s1786_s24 = scalar_lea.vmem %s21_s20, 256  ;;  %p1791_p1 = scmp.lt.s32.totalorder %s21_s20, %s21_s20 }
   0x4   :  { %p1787_p0 = scmp.ne.s32.totalorder %s21_s20, %s1786_s24  ;;  %p1792_p2 = scmp.lt.s32.totalorder %s1786_s24, %s1786_s24 }
   0x6   :  { %p1793_p3 = por %p1792_p2, %p1791_p1 }
   0x8   :  { %p1794_p4 = pnand %p1793_p3, %p1787_p0 }
   0xa   :  { %1797 = shalt.err (!%p1794_p4)
}
   0xb   :  { %s1838_s25 = smov [#allocation2]   ;;  %s1839_s26 = smov 128  }
   0xc   :  { %s1840_s27 = smov 8   ;;  %s1798_s1 = scalar_lea.vmem %s34_s23, 16 }
   0xd   :  { %26 = dma.vmem_to_smem %s21_s20, 256, %s1838_s25, [#allocation4], %s1839_s26, %s1839_s26, %s1840_s27  }
   0xe   :  { %p1799_p5 = scmp.ne.s32.totalorder %s34_s23, %s1798_s1  ;;  %p1803_p6 = scmp.lt.s32.totalorder %s34_s23, %s34_s23 }
   0xf   :  { %p1804_p7 = scmp.lt.s32.totalorder %s1798_s1, %s1798_s1 }
  0x11   :  { %p1805_p8 = por %p1804_p7, %p1803_p6 }
  0x13   :  { %p1806_p9 = pnand %p1805_p8, %p1799_p5 }
  0x15   :  { %1809 = shalt.err (!%p1806_p9)
}
  0x16   :  { %s1841_s2 = smov [#allocation5]  }
  0x17   :  { %36 = dma.vmem_to_smem %s34_s23, 16, %s1841_s2, [#allocation6]  }
  0x18   :  { %1832 = dma.done.wait [#allocation4], 256  }
  0x19   :  { %1833 = vsyncadd [#allocation4], 4294967040 }
  0x1a   :  { %1834 = dma.done.wait [#allocation6], 16  }
  0x1b   :  { %1835 = vsyncadd [#allocation6], 4294967280 }
  0x1c   :  { %47 = sfence }
  0x1d   :  { %v1735_v0 = vld [vmem:[%s3052_s3] sm:$0xff]   ;;  %s53_s30 = sld [smem:[#allocation2]]  ;;  %v1895_v2 = vld [vmem:[%s3049_s0 + $0x8] sm:$0xff]  ;;  %v2096_v61 = vld [vmem:[%s3049_s0 + $0x10] sm:$0xff]  ;;  %s2211_s23 = sld [smem:[#allocation2 + $0x1]]  ;;  %vm736_vm0 = vcmask 130048  }
  0x1e   :  { %1648 = vmatprep.subr.bf16.mxu0 %v1735_v0  ;;  %s1471_s6 = sld [smem:[#allocation2 + $0x80]]  ;;  %v1890_v1 = vld [vmem:[%s3049_s0] sm:$0xff]  ;;  %v1907_v4 = vld [vmem:[%s3049_s0 + $0x28] sm:$0xff]  ;;  %3137 = vst [vmem:[#allocation30_spill] sm:$0xff] %v2096_v61  ;;  %v2101_v62 = vld [vmem:[%s3049_s0 + $0x18] sm:$0xff]  ;;  %s2243_s10 = sld [smem:[#allocation2 + $0x101]] }
  0x1f   :  { %1649 = vmatpush3.bf16.msra.mxu0 %v1735_v0  ;;  %s1476_s7 = sld [smem:[#allocation2 + $0x100]]  ;;  %v1900_v3 = vld [vmem:[%s3049_s0 + $0x20] sm:$0xff]  ;;  %v1923_v7 = vld [vmem:[%s3049_s0 + $0x48] sm:$0xff]  ;;  %3138 = vst [vmem:[#allocation31_spill] sm:$0xff] %v2101_v62  ;;  %v2106_v63 = vld [vmem:[%s3049_s0 + $0x30] sm:$0xff]  ;;  %s2284_s18 = sld [smem:[#allocation2 + $0x181]] }
  0x20   :  { %s1481_s8 = sld [smem:[#allocation2 + $0x180]]  ;;  %v1912_v5 = vld [vmem:[%s3049_s0 + $0x40] sm:$0xff]  ;;  %3119 = vst [vmem:[#allocation12_spill] sm:$0xff] %v1923_v7  ;;  %v1933_v9 = vld [vmem:[%s3049_s0 + $0x68] sm:$0xff]  ;;  %3139 = vst [vmem:[#allocation32_spill] sm:$0xff] %v2106_v63  ;;  %s2317_s19 = sld [smem:[#allocation2 + $0x301]] }
  0x21   :  { %s1885_s9 = sld [smem:[#allocation2 + $0x200]]  ;;  %3118 = vst [vmem:[#allocation11_spill] sm:$0xff] %v1912_v5  ;;  %v1928_v8 = vld [vmem:[%s3049_s0 + $0x60] sm:$0xff]  ;;  %3121 = vst [vmem:[#allocation14_spill] sm:$0xff] %v1933_v9  ;;  %v1951_v14 = vld [vmem:[%s3049_s0 + $0x88] sm:$0xff]  ;;  %s2319_s22 = sld [smem:[#allocation2 + $0x381]] }
  0x22   :  { %s1902_s15 = sld [smem:[#allocation2 + $0x280]]  ;;  %3120 = vst [vmem:[#allocation13_spill] sm:$0xff] %v1928_v8  ;;  %v1946_v13 = vld [vmem:[%s3049_s0 + $0x80] sm:$0xff]  ;;  %3123 = vst [vmem:[#allocation16_spill] sm:$0xff] %v1951_v14  ;;  %v1971_v20 = vld [vmem:[%s3049_s0 + $0xa8] sm:$0xff]  ;;  %s2336_s24 = sld [smem:[#allocation2 + $0x481]] }
  0x23   :  { %s1914_s20 = sld [smem:[#allocation2 + $0x300]]  ;;  %v1918_v6 = vstv %s53_s30  ;;  %3122 = vst [vmem:[#allocation15_spill] sm:$0xff] %v1946_v13  ;;  %v1966_v19 = vld [vmem:[%s3049_s0 + $0xa0] sm:$0xff]  ;;  %3124 = vst [vmem:[#allocation17_spill] sm:$0xff] %v1971_v20  ;;  %v1993_v26 = vld [vmem:[%s3049_s0 + $0xc8] sm:$0xff]  ;;  %s2241_s30 = sld [smem:[#allocation2 + $0x81]] }
  0x24   :  { %s1916_s21 = sld [smem:[#allocation2 + $0x380]]  ;;  %v55_v10 = vmul.f32 %v1918_v6, %v1890_v1  ;;  %v56_v11 = vmul.f32 %v1918_v6, %v1895_v2  ;;  %v1941_v12 = vstv %s1471_s6  ;;  %v1988_v25 = vld [vmem:[%s3049_s0 + $0xc0] sm:$0xff]  ;;  %3126 = vst [vmem:[#allocation19_spill] sm:$0xff] %v1993_v26  ;;  %v2009_v32 = vld [vmem:[%s3049_s0 + $0xe8] sm:$0xff]  ;;  %s2349_s25 = sld [smem:[#allocation2 + $0x501]] }
  0x25   :  { %s1935_s28 = sld [smem:[#allocation2 + $0x400]]  ;;  %v66_v15 = vmul.f32 %v1900_v3, %v1941_v12  ;;  %v67_v16 = vmul.f32 %v1907_v4, %v1941_v12  ;;  %v1959_v17 = vstv %s1476_s7  ;;  %3125 = vst [vmem:[#allocation18_spill] sm:$0xff] %v1988_v25  ;;  %v2004_v31 = vld [vmem:[%s3049_s0 + $0xe0] sm:$0xff]  ;;  %3128 = vst [vmem:[#allocation21_spill] sm:$0xff] %v2009_v32  ;;  %v2029_v38 = vld [vmem:[%s3049_s0 + $0x108] sm:$0xff]  ;;  %s2403_s2 = sld [smem:[#allocation2 + $0x2]] }
  0x26   :  { %s1953_s12 = sld [smem:[#allocation2 + $0x480]]  ;;  %v1961_v18 = vstv %s1481_s8  ;;  %v81_v21 = vmul.f32 %v1912_v5, %v1959_v17  ;;  %v82_v22 = vmul.f32 %v1923_v7, %v1959_v17  ;;  %3127 = vst [vmem:[#allocation20_spill] sm:$0xff] %v2004_v31  ;;  %v2024_v37 = vld [vmem:[%s3049_s0 + $0x100] sm:$0xff]  ;;  %3130 = vst [vmem:[#allocation23_spill] sm:$0xff] %v2029_v38  ;;  %v2045_v44 = vld [vmem:[%s3049_s0 + $0x128] sm:$0xff]  ;;  %s2421_s29 = sld [smem:[#allocation2 + $0x182]] }
  0x27   :  { %s1973_s16 = sld [smem:[#allocation2 + $0x500]]  ;;  %v96_v23 = vmul.f32 %v1928_v8, %v1961_v18  ;;  %v97_v24 = vmul.f32 %v1933_v9, %v1961_v18  ;;  %v70_v27 = vadd.f32 %v66_v15, %v55_v10  ;;  %v71_v28 = vadd.f32 %v67_v16, %v56_v11  ;;  %3129 = vst [vmem:[#allocation22_spill] sm:$0xff] %v2024_v37  ;;  %v2040_v43 = vld [vmem:[%s3049_s0 + $0x120] sm:$0xff]  ;;  %v2063_v50 = vld [vmem:[%s3049_s0 + $0x148] sm:$0xff]  ;;  %v2117_v16 = vld [vmem:[%s3049_s0 + $0x38] sm:$0xff]  ;;  %s2433_s11 = sld [smem:[#allocation2 + $0x302]] }
  0x28   :  { %s1975_s17 = sld [smem:[#allocation2 + $0x580]]  ;;  %v1996_v29 = vstv %s1885_s9  ;;  %v1999_v30 = vstv %s1902_s15  ;;  %3131 = vst [vmem:[#allocation24_spill] sm:$0xff] %v2040_v43  ;;  %3132 = vst [vmem:[#allocation25_spill] sm:$0xff] %v2045_v44  ;;  %v2058_v49 = vld [vmem:[%s3049_s0 + $0x140] sm:$0xff]  ;;  %v2079_v56 = vld [vmem:[%s3049_s0 + $0x168] sm:$0xff]  ;;  %s2355_s9 = sld [smem:[#allocation2 + $0x581]] }
  0x29   :  { %s2011_s1 = sld [smem:[#allocation5]]  ;;  %v111_v33 = vmul.f32 %v1946_v13, %v1996_v29  ;;  %v112_v34 = vmul.f32 %v1951_v14, %v1996_v29  ;;  %v126_v35 = vmul.f32 %v1966_v19, %v1999_v30  ;;  %v127_v36 = vmul.f32 %v1971_v20, %v1999_v30  ;;  %3133 = vst [vmem:[#allocation26_spill] sm:$0xff] %v2058_v49  ;;  %v2074_v55 = vld [vmem:[%s3049_s0 + $0x160] sm:$0xff]  ;;  %s2357_s15 = sld [smem:[#allocation5 + $0x1]] }
  0x2a   :  { %v85_v39 = vadd.f32 %v81_v21, %v70_v27  ;;  %v86_v40 = vadd.f32 %v82_v22, %v71_v28  ;;  %v2032_v41 = vstv %s1914_s20  ;;  %v2035_v42 = vstv %s1916_s21  ;;  %3134 = vst [vmem:[#allocation27_spill] sm:$0xff] %v2063_v50  ;;  %3135 = vst [vmem:[#allocation28_spill] sm:$0xff] %v2074_v55  ;;  %v2122_v21 = vld [vmem:[%s3049_s0 + $0x50] sm:$0xff]  ;;  %v2143_v28 = vld [vmem:[%s3049_s0 + $0x58] sm:$0xff]  ;;  %s2439_s6 = sld [smem:[#allocation2 + $0x382]]  ;;  %s2552_s3 = sld [smem:[#allocation2 + $0x3]] }
  0x2b   :  { %v141_v45 = vmul.f32 %v1988_v25, %v2032_v41  ;;  %v142_v46 = vmul.f32 %v1993_v26, %v2032_v41  ;;  %v156_v47 = vmul.f32 %v2004_v31, %v2035_v42  ;;  %v157_v48 = vmul.f32 %v2009_v32, %v2035_v42  ;;  %3136 = vst [vmem:[#allocation29_spill] sm:$0xff] %v2079_v56  ;;  %s2441_s20 = sld [smem:[#allocation2 + $0x402]]  ;;  %s2554_s7 = sld [smem:[#allocation2 + $0x83]] }
  0x2c   :  { %v100_v51 = vadd.f32 %v96_v23, %v85_v39  ;;  %v101_v52 = vadd.f32 %v97_v24, %v86_v40  ;;  %v2066_v53 = vstv %s1935_s28  ;;  %v2069_v54 = vstv %s1953_s12  ;;  %3140 = vst [vmem:[#allocation33_spill] sm:$0xff] %v2117_v16  ;;  %3141 = vst [vmem:[#allocation34_spill] sm:$0xff] %v2122_v21  ;;  %s2296_s28 = sld [smem:[#allocation2 + $0x201]]  ;;  %s2473_s21 = sld [smem:[#allocation2 + $0x502]] }
  0x2d   :  { %v171_v57 = vmul.f32 %v2024_v37, %v2066_v53  ;;  %v172_v58 = vmul.f32 %v2029_v38, %v2066_v53  ;;  %v2087_v59 = vmul.f32 %v2040_v43, %v2069_v54  ;;  %v2091_v60 = vmul.f32 %v2045_v44, %v2069_v54  ;;  %3142 = vst [vmem:[#allocation35_spill] sm:$0xff] %v2143_v28  ;;  %s2298_s12 = sld [smem:[#allocation2 + $0x281]]  ;;  %s2483_s13 = sld [smem:[#allocation2 + $0x582]] }
  0x2e   :  { %v115_v0 = vadd.f32 %v111_v33, %v100_v51  ;;  %v116_v10 = vadd.f32 %v112_v34, %v101_v52  ;;  %v2109_v11 = vstv %s1973_s16  ;;  %v2112_v15 = vstv %s1975_s17  ;;  %v2148_v33 = vld [vmem:[%s3049_s0 + $0x70] sm:$0xff]  ;;  %v2158_v52 = vld [vmem:[%s3049_s0 + $0x78] sm:$0xff]  ;;  %s2413_s16 = sld [smem:[#allocation2 + $0x82]]  ;;  %s2562_s8 = sld [smem:[#allocation2 + $0x103]] }
  0x2f   :  { %v2126_v22 = vmul.f32 %v2058_v49, %v2109_v11  ;;  %v2130_v23 = vmul.f32 %v2063_v50, %v2109_v11  ;;  %v2134_v24 = vmul.f32 %v2074_v55, %v2112_v15  ;;  %v2138_v27 = vmul.f32 %v2079_v56, %v2112_v15  ;;  %3143 = vst [vmem:[#allocation36_spill] sm:$0xff] %v2148_v33  ;;  %v2163_v56 = vld [vmem:[%s3049_s0 + $0x90] sm:$0xff]  ;;  %s2415_s17 = sld [smem:[#allocation2 + $0x102]] }
  0x30   :  { %v130_v34 = vadd.f32 %v126_v35, %v115_v0  ;;  %v131_v39 = vadd.f32 %v127_v36, %v116_v10  ;;  %v2151_v40 = vstv %s2011_s1  ;;  %v57_v51 = vmul.f32 %v1918_v6, %v2096_v61  ;;  %3144 = vst [vmem:[#allocation37_spill] sm:$0xff] %v2158_v52  ;;  %3145 = vst [vmem:[#allocation38_spill] sm:$0xff] %v2163_v56  ;;  %v2176_v10 = vld [vmem:[%s3049_s0 + $0x98] sm:$0xff]  ;;  %v2181_v61 = vld [vmem:[%s3049_s0 + $0xb0] sm:$0xff]  ;;  %s2471_s1 = sld [smem:[#allocation2 + $0x482]] }
  0x31   :  { %v58_v55 = vmul.f32 %v1918_v6, %v2101_v62  ;;  %v68_v35 = vmul.f32 %v2106_v63, %v1941_v12  ;;  %v69_v36 = vmul.f32 %v2117_v16, %v1941_v12  ;;  %v83_v0 = vmul.f32 %v2122_v21, %v1959_v17  ;;  %3146 = vst [vmem:[#allocation39_spill] sm:$0xff] %v2176_v10  ;;  %v2190_v21 = vld [vmem:[%s3049_s0 + $0xb8] sm:$0xff]  ;;  %v2195_v16 = vld [vmem:[%s3049_s0 + $0xd0] sm:$0xff]  ;;  %s2485_s14 = sld [smem:[#allocation5 + $0x2]] }
  0x32   :  { %3147 = vst [vmem:[#allocation40_spill] sm:$0xff] %v2181_v61  ;;  %v145_v6 = vadd.f32 %v141_v45, %v130_v34  ;;  %v146_v62 = vadd.f32 %v142_v46, %v131_v39  ;;  %v84_v63 = vmul.f32 %v2143_v28, %v1959_v17  ;;  %v98_v12 = vmul.f32 %v2148_v33, %v1961_v18  ;;  %v2204_v46 = vld [vmem:[%s3049_s0 + $0xd8] sm:$0xff]  ;;  %v2209_v34 = vld [vmem:[%s3049_s0 + $0xf0] sm:$0xff] }
  0x33   :  { %3148 = vst [vmem:[#allocation41_spill] sm:$0xff] %v2190_v21  ;;  %3149 = vst [vmem:[#allocation42_spill] sm:$0xff] %v2195_v16  ;;  %v72_v50 = vadd.f32 %v68_v35, %v57_v51  ;;  %v73_v49 = vadd.f32 %v69_v36, %v58_v55  ;;  %v99_v45 = vmul.f32 %v2158_v52, %v1961_v18  ;;  %v2220_v35 = vld [vmem:[%s3049_s0 + $0xf8] sm:$0xff]  ;;  %v2225_v36 = vld [vmem:[%s3049_s0 + $0x110] sm:$0xff] }
  0x34   :  { %v113_v17 = vmul.f32 %v2163_v56, %v1996_v29  ;;  %3150 = vst [vmem:[#allocation43_spill] sm:$0xff] %v2209_v34  ;;  %v160_v39 = vadd.f32 %v156_v47, %v145_v6  ;;  %v161_v55 = vadd.f32 %v157_v48, %v146_v62  ;;  %v114_v18 = vmul.f32 %v2176_v10, %v1996_v29  ;;  %v2234_v48 = vld [vmem:[%s3049_s0 + $0x118] sm:$0xff]  ;;  %v2239_v62 = vld [vmem:[%s3049_s0 + $0x130] sm:$0xff] }
  0x35   :  { %v128_v51 = vmul.f32 %v2181_v61, %v1999_v30  ;;  %3151 = vst [vmem:[#allocation44_spill] sm:$0xff] %v2225_v36  ;;  %v87_v56 = vadd.f32 %v83_v0, %v72_v50  ;;  %v88_v52 = vadd.f32 %v84_v63, %v73_v49  ;;  %v129_v47 = vmul.f32 %v2190_v21, %v1999_v30  ;;  %v2252_v0 = vld [vmem:[%s3049_s0 + $0x138] sm:$0xff]  ;;  %v2257_v6 = vld [vmem:[%s3049_s0 + $0x150] sm:$0xff] }
  0x36   :  { %v143_v29 = vmul.f32 %v2195_v16, %v2032_v41  ;;  %3152 = vst [vmem:[#allocation45_spill] sm:$0xff] %v2239_v62  ;;  %v175_v49 = vadd.f32 %v171_v57, %v160_v39  ;;  %v176_v50 = vadd.f32 %v172_v58, %v161_v55  ;;  %v144_v30 = vmul.f32 %v2204_v46, %v2032_v41  ;;  %v2266_v39 = vld [vmem:[%s3049_s0 + $0x158] sm:$0xff]  ;;  %v2271_v55 = vld [vmem:[%s3049_s0 + $0x170] sm:$0xff] }
  0x37   :  { %v158_v63 = vmul.f32 %v2209_v34, %v2035_v42  ;;  %v102_v16 = vadd.f32 %v98_v12, %v87_v56  ;;  %v103_v57 = vadd.f32 %v99_v45, %v88_v52  ;;  %v159_v58 = vmul.f32 %v2220_v35, %v2035_v42  ;;  %v2282_v12 = vld [vmem:[%s3049_s0 + $0x178] sm:$0xff] }
  0x38   :  { %v173_v41 = vmul.f32 %v2225_v36, %v2066_v53  ;;  %v190_v34 = vadd.f32 %v2087_v59, %v175_v49  ;;  %v191_v56 = vadd.f32 %v2091_v60, %v176_v50  ;;  %v174_v42 = vmul.f32 %v2234_v48, %v2066_v53 }
  0x39   :  { %v188_v52 = vmul.f32 %v2239_v62, %v2069_v54  ;;  %v117_v45 = vadd.f32 %v113_v17, %v102_v16  ;;  %v118_v36 = vadd.f32 %v114_v18, %v103_v57  ;;  %v189_v59 = vmul.f32 %v2252_v0, %v2069_v54 }
  0x3a   :  { %v203_v60 = vmul.f32 %v2257_v6, %v2109_v11  ;;  %v205_v53 = vadd.f32 %v2126_v22, %v190_v34  ;;  %v206_v49 = vadd.f32 %v2130_v23, %v191_v56  ;;  %v204_v50 = vmul.f32 %v2266_v39, %v2109_v11 }
  0x3b   :  { %v218_v62 = vmul.f32 %v2271_v55, %v2112_v15  ;;  %v132_v54 = vadd.f32 %v128_v51, %v117_v45  ;;  %v133_v16 = vadd.f32 %v129_v47, %v118_v36  ;;  %v219_v17 = vmul.f32 %v2282_v12, %v2112_v15 }
  0x3c   :  { %v2303_v22 = vstv %s2211_s23  ;;  %v220_v23 = vadd.f32 %v2134_v24, %v205_v53  ;;  %v221_v34 = vadd.f32 %v2138_v27, %v206_v49  ;;  %v2312_v51 = vstv %s2241_s30  ;;  %s2334_s23 = sld [smem:[#allocation2 + $0x401]]  ;;  %s2423_s30 = sld [smem:[#allocation2 + $0x202]] }
  0x3d   :  { %v232_v11 = vmul.f32 %v2303_v22, %v1890_v1  ;;  %v233_v18 = vmul.f32 %v2303_v22, %v1895_v2  ;;  %v147_v57 = vadd.f32 %v143_v29, %v132_v54  ;;  %v148_v56 = vadd.f32 %v144_v30, %v133_v16 }
  0x3e   :  { %v2315_v36 = vstv %s2243_s10  ;;  %v226_v15 = vadd.f32 %v2151_v40, %v220_v23  ;;  %v227_v24 = vadd.f32 %v2151_v40, %v221_v34  ;;  %v238_v27 = vmul.f32 %v1900_v3, %v2312_v51  ;;  %s2431_s10 = sld [smem:[#allocation2 + $0x282]] }
  0x3f   :  { %v239_v47 = vmul.f32 %v1907_v4, %v2312_v51  ;;  %v162_v29 = vadd.f32 %v158_v63, %v147_v57  ;;  %v163_v30 = vadd.f32 %v159_v58, %v148_v56  ;;  %v248_v45 = vmul.f32 %v1912_v5, %v2315_v36 }
  0x40   :  { %v249_v53 = vmul.f32 %v1923_v7, %v2315_v36  ;;  %v718_v49 = vpack.c.bf16 %v227_v24, %v226_v15  ;;  %v242_v54 = vadd.f32 %v238_v27, %v232_v11  ;;  %v2332_v23 = vstv %s2284_s18  ;;  %s2564_s18 = sld [smem:[#allocation2 + $0x183]] }
  0x41   :  { %v243_v16 = vadd.f32 %v239_v47, %v233_v18  ;;  %v177_v34 = vadd.f32 %v173_v41, %v162_v29  ;;  %v178_v63 = vadd.f32 %v174_v42, %v163_v30  ;;  %v258_v58 = vmul.f32 %v1928_v8, %v2332_v23 }
  0x42   :  { %v259_v57 = vmul.f32 %v1933_v9, %v2332_v23  ;;  %1650 = vmatprep.mubr.msk.bf16.mxu0 %vm736_vm0, %v718_v49  ;;  %v252_v56 = vadd.f32 %v248_v45, %v242_v54  ;;  %v2344_v11 = vstv %s2296_s28  ;;  %v2347_v18 = vstv %s2298_s12  ;;  %s2578_s28 = sld [smem:[#allocation2 + $0x203]] }
  0x43   :  { %v253_v15 = vadd.f32 %v249_v53, %v243_v16  ;;  %v192_v41 = vadd.f32 %v188_v52, %v177_v34  ;;  %v193_v42 = vadd.f32 %v189_v59, %v178_v63  ;;  %v268_v24 = vmul.f32 %v1946_v13, %v2344_v11  ;;  %s2580_s12 = sld [smem:[#allocation2 + $0x283]] }
  0x44   :  { %v269_v27 = vmul.f32 %v1951_v14, %v2344_v11  ;;  %v262_v47 = vadd.f32 %v258_v58, %v252_v56  ;;  %v278_v30 = vmul.f32 %v1966_v19, %v2347_v18  ;;  %v279_v52 = vmul.f32 %v1971_v20, %v2347_v18 }
  0x45   :  { %v263_v29 = vadd.f32 %v259_v57, %v253_v15  ;;  %v207_v59 = vadd.f32 %v203_v60, %v192_v41  ;;  %v208_v45 = vadd.f32 %v204_v50, %v193_v42  ;;  %v287_v53 = vstv %s2317_s19  ;;  %s2598_s19 = sld [smem:[#allocation2 + $0x303]] }
  0x46   :  { %v297_v49 = vstv %s2319_s22  ;;  %v272_v54 = vadd.f32 %v268_v24, %v262_v47  ;;  %v288_v34 = vmul.f32 %v1988_v25, %v287_v53  ;;  %v289_v63 = vmul.f32 %v1993_v26, %v287_v53  ;;  %s2600_s22 = sld [smem:[#allocation2 + $0x383]] }
  0x47   :  { %v273_v16 = vadd.f32 %v269_v27, %v263_v29  ;;  %v222_v58 = vadd.f32 %v218_v62, %v207_v59  ;;  %v223_v57 = vadd.f32 %v219_v17, %v208_v45  ;;  %v298_v56 = vmul.f32 %v2004_v31, %v297_v49 }
  0x48   :  { %v299_v15 = vmul.f32 %v2009_v32, %v297_v49  ;;  %v282_v20 = vadd.f32 %v278_v30, %v272_v54  ;;  %v307_v50 = vstv %s2334_s23  ;;  %v317_v41 = vstv %s2336_s24  ;;  %s2621_s23 = sld [smem:[#allocation2 + $0x403]] }
  0x49   :  { %v283_v60 = vadd.f32 %v279_v52, %v273_v16  ;;  %v228_v42 = vadd.f32 %v2151_v40, %v222_v58  ;;  %v229_v24 = vadd.f32 %v2151_v40, %v223_v57  ;;  %v308_v27 = vmul.f32 %v2024_v37, %v307_v50  ;;  %v3153_v58 = vld [vmem:[#allocation26_spill] sm:$0xff]  ;;  %v3154_v40 = vld [vmem:[#allocation27_spill] sm:$0xff]  ;;  %s2623_s24 = sld [smem:[#allocation2 + $0x483]] }
  0x4a   :  { %v309_v62 = vmul.f32 %v2029_v38, %v307_v50  ;;  %v292_v17 = vadd.f32 %v288_v34, %v282_v20  ;;  %v318_v29 = vmul.f32 %v2040_v43, %v317_v41  ;;  %v319_v59 = vmul.f32 %v2045_v44, %v317_v41  ;;  %v3155_v38 = vld [vmem:[#allocation28_spill] sm:$0xff]  ;;  %v3156_v34 = vld [vmem:[#allocation29_spill] sm:$0xff] }
  0x4b   :  { %v293_v47 = vadd.f32 %v289_v63, %v283_v60  ;;  %v719_v45 = vpack.c.bf16 %v229_v24, %v228_v42  ;;  %v327_v32 = vstv %s2349_s25  ;;  %v337_v30 = vstv %s2355_s9  ;;  %v3157_v60 = vld [vmem:[#allocation30_spill] sm:$0xff]  ;;  %v3158_v42 = vld [vmem:[#allocation31_spill] sm:$0xff]  ;;  %s2639_s25 = sld [smem:[#allocation2 + $0x503]] }
  0x4c   :  { %v2380_v52 = vstv %s2357_s15  ;;  %v302_v54 = vadd.f32 %v298_v56, %v292_v17  ;;  %v328_v31 = vmul.f32 %v3153_v58, %v327_v32  ;;  %v329_v57 = vmul.f32 %v3154_v40, %v327_v32  ;;  %v3159_v56 = vld [vmem:[#allocation32_spill] sm:$0xff]  ;;  %v3160_v17 = vld [vmem:[#allocation33_spill] sm:$0xff]  ;;  %s2641_s9 = sld [smem:[#allocation2 + $0x583]] }
  0x4d   :  { %v303_v16 = vadd.f32 %v299_v15, %v293_v47  ;;  %1651 = vmatmul.mubr.msk.bf16.vlgmr.msra.gmra.mrb[0].mxu0 %vm736_vm0, %v719_v45  ;;  %v338_v20 = vmul.f32 %v3155_v38, %v337_v30  ;;  %v339_v63 = vmul.f32 %v3156_v34, %v337_v30  ;;  %v234_v44 = vmul.f32 %v2303_v22, %v3157_v60  ;;  %v3161_v45 = vld [vmem:[#allocation34_spill] sm:$0xff]  ;;  %v3162_v38 = vld [vmem:[#allocation37_spill] sm:$0xff]  ;;  %s2665_s15 = sld [smem:[#allocation5 + $0x3]] }
  0x4e   :  { %v235_v24 = vmul.f32 %v2303_v22, %v3158_v42  ;;  %v312_v43 = vadd.f32 %v308_v27, %v302_v54  ;;  %v240_v15 = vmul.f32 %v3159_v56, %v2312_v51  ;;  %v241_v47 = vmul.f32 %v3160_v17, %v2312_v51  ;;  %v3163_v51 = vld [vmem:[#allocation38_spill] sm:$0xff] }
  0x4f   :  { %v313_v37 = vadd.f32 %v309_v62, %v303_v16  ;;  %v250_v40 = vmul.f32 %v3161_v45, %v2315_v36  ;;  %v251_v34 = vmul.f32 %v2143_v28, %v2315_v36  ;;  %v260_v60 = vmul.f32 %v2148_v33, %v2332_v23 }
  0x50   :  { %v261_v22 = vmul.f32 %v3162_v38, %v2332_v23  ;;  %v322_v27 = vadd.f32 %v318_v29, %v312_v43  ;;  %v244_v54 = vadd.f32 %v240_v15, %v234_v44  ;;  %v245_v16 = vadd.f32 %v241_v47, %v235_v24  ;;  %v3164_v29 = vld [vmem:[#allocation42_spill] sm:$0xff]  ;;  %v3165_v15 = vld [vmem:[#allocation43_spill] sm:$0xff] }
  0x51   :  { %v323_v62 = vadd.f32 %v319_v59, %v313_v37  ;;  %v270_v17 = vmul.f32 %v3163_v51, %v2344_v11  ;;  %v271_v45 = vmul.f32 %v2176_v10, %v2344_v11  ;;  %v280_v36 = vmul.f32 %v2181_v61, %v2347_v18 }
  0x52   :  { %v281_v33 = vmul.f32 %v2190_v21, %v2347_v18  ;;  %v332_v37 = vadd.f32 %v328_v31, %v322_v27  ;;  %v254_v44 = vadd.f32 %v250_v40, %v244_v54  ;;  %v255_v23 = vadd.f32 %v251_v34, %v245_v16  ;;  %v3166_v31 = vld [vmem:[#allocation44_spill] sm:$0xff]  ;;  %v3167_v34 = vld [vmem:[#allocation45_spill] sm:$0xff] }
  0x53   :  { %v333_v43 = vadd.f32 %v329_v57, %v323_v62  ;;  %v290_v59 = vmul.f32 %v3164_v29, %v287_v53  ;;  %v291_v24 = vmul.f32 %v2204_v46, %v287_v53  ;;  %v300_v11 = vmul.f32 %v3165_v15, %v297_v49 }
  0x54   :  { %v301_v47 = vmul.f32 %v2220_v35, %v297_v49  ;;  %v342_v18 = vadd.f32 %v338_v20, %v332_v37  ;;  %v264_v61 = vadd.f32 %v260_v60, %v254_v44  ;;  %v265_v10 = vadd.f32 %v261_v22, %v255_v23 }
  0x55   :  { %v343_v21 = vadd.f32 %v339_v63, %v333_v43  ;;  %v310_v57 = vmul.f32 %v3166_v31, %v307_v50  ;;  %v311_v40 = vmul.f32 %v2234_v48, %v307_v50  ;;  %v320_v27 = vmul.f32 %v3167_v34, %v317_v41 }
  0x56   :  { %v321_v53 = vmul.f32 %v2252_v0, %v317_v41  ;;  %v348_v62 = vadd.f32 %v2380_v52, %v342_v18  ;;  %v274_v54 = vadd.f32 %v270_v17, %v264_v61  ;;  %v275_v16 = vadd.f32 %v271_v45, %v265_v10 }
  0x57   :  { %v349_v49 = vadd.f32 %v2380_v52, %v343_v21  ;;  %v330_v20 = vmul.f32 %v2257_v6, %v327_v32  ;;  %v331_v50 = vmul.f32 %v2266_v39, %v327_v32  ;;  %v340_v63 = vmul.f32 %v2271_v55, %v337_v30 }
  0x58   :  { %v341_v41 = vmul.f32 %v2282_v12, %v337_v30  ;;  %v284_v21 = vadd.f32 %v280_v36, %v274_v54  ;;  %v285_v10 = vadd.f32 %v281_v33, %v275_v16  ;;  %v2444_v60 = vstv %s2403_s2  ;;  %s2707_s2 = sld [smem:[#allocation2 + $0x4]] }
  0x59   :  { %v720_v61 = vpack.c.bf16 %v349_v49, %v348_v62  ;;  %v354_v17 = vmul.f32 %v2444_v60, %v1890_v1  ;;  %v355_v32 = vmul.f32 %v2444_v60, %v1895_v2  ;;  %v2451_v45 = vstv %s2413_s16  ;;  %s2713_s16 = sld [smem:[#allocation2 + $0x84]] }
  0x5a   :  { %v2454_v30 = vstv %s2415_s17  ;;  %v294_v22 = vadd.f32 %v290_v59, %v284_v21  ;;  %v295_v37 = vadd.f32 %v291_v24, %v285_v10  ;;  %v360_v36 = vmul.f32 %v1900_v3, %v2451_v45  ;;  %s2719_s17 = sld [smem:[#allocation2 + $0x104]] }
  0x5b   :  { %1654 = vmatprep.mubr.msk.bf16.mxu0 %vm736_vm0, %v720_v61  ;;  %v361_v33 = vmul.f32 %v1907_v4, %v2451_v45  ;;  %v370_v43 = vmul.f32 %v1912_v5, %v2454_v30  ;;  %v371_v44 = vmul.f32 %v1923_v7, %v2454_v30  ;;  %v2466_v23 = vstv %s2421_s29  ;;  %v3168_v7 = vld [vmem:[#allocation17_spill] sm:$0xff]  ;;  %s2721_s29 = sld [smem:[#allocation2 + $0x184]] }
  0x5c   :  { %v2469_v18 = vstv %s2423_s30  ;;  %v304_v62 = vadd.f32 %v300_v11, %v294_v22  ;;  %v305_v59 = vadd.f32 %v301_v47, %v295_v37  ;;  %v364_v24 = vadd.f32 %v360_v36, %v354_v17  ;;  %s2735_s30 = sld [smem:[#allocation2 + $0x204]] }
  0x5d   :  { %v365_v49 = vadd.f32 %v361_v33, %v355_v32  ;;  %v380_v54 = vmul.f32 %v1928_v8, %v2466_v23  ;;  %v381_v16 = vmul.f32 %v1933_v9, %v2466_v23  ;;  %v390_v11 = vmul.f32 %v1946_v13, %v2469_v18 }
  0x5e   :  { %v391_v47 = vmul.f32 %v1951_v14, %v2469_v18  ;;  %v314_v61 = vadd.f32 %v310_v57, %v304_v62  ;;  %v315_v21 = vadd.f32 %v311_v40, %v305_v59  ;;  %v374_v10 = vadd.f32 %v370_v43, %v364_v24  ;;  %v3169_v62 = vld [vmem:[#allocation20_spill] sm:$0xff]  ;;  %v3170_v24 = vld [vmem:[#allocation21_spill] sm:$0xff] }
  0x5f   :  { %v375_v17 = vadd.f32 %v371_v44, %v365_v49  ;;  %v399_v32 = vstv %s2431_s10  ;;  %v2489_v22 = vstv %s2433_s11  ;;  %v2492_v37 = vstv %s2439_s6  ;;  %s2742_s10 = sld [smem:[#allocation2 + $0x284]] }
  0x60   :  { %v2495_v36 = vstv %s2441_s20  ;;  %v324_v33 = vadd.f32 %v320_v27, %v314_v61  ;;  %v325_v13 = vadd.f32 %v321_v53, %v315_v21  ;;  %v384_v9 = vadd.f32 %v380_v54, %v374_v10  ;;  %v3171_v54 = vld [vmem:[#allocation22_spill] sm:$0xff]  ;;  %v3172_v61 = vld [vmem:[#allocation23_spill] sm:$0xff]  ;;  %s2758_s11 = sld [smem:[#allocation2 + $0x304]] }
  0x61   :  { %v385_v8 = vadd.f32 %v381_v16, %v375_v17  ;;  %v400_v14 = vmul.f32 %v1966_v19, %v399_v32  ;;  %v401_v5 = vmul.f32 %v3168_v7, %v399_v32  ;;  %v410_v57 = vmul.f32 %v1988_v25, %v2489_v22 }
  0x62   :  { %v411_v40 = vmul.f32 %v1993_v26, %v2489_v22  ;;  %v334_v43 = vadd.f32 %v330_v20, %v324_v33  ;;  %v335_v44 = vadd.f32 %v331_v50, %v325_v13  ;;  %v394_v27 = vadd.f32 %v390_v11, %v384_v9 }
  0x63   :  { %v395_v53 = vadd.f32 %v391_v47, %v385_v8  ;;  %v420_v59 = vmul.f32 %v3169_v62, %v2492_v37  ;;  %v421_v49 = vmul.f32 %v3170_v24, %v2492_v37  ;;  %v430_v16 = vmul.f32 %v3171_v54, %v2495_v36  ;;  %v3173_v54 = vld [vmem:[#allocation24_spill] sm:$0xff] }
  0x64   :  { %v431_v21 = vmul.f32 %v3172_v61, %v2495_v36  ;;  %v344_v10 = vadd.f32 %v340_v63, %v334_v43  ;;  %v345_v17 = vadd.f32 %v341_v41, %v335_v44  ;;  %v404_v26 = vadd.f32 %v400_v14, %v394_v27  ;;  %v3174_v61 = vld [vmem:[#allocation25_spill] sm:$0xff]  ;;  %v3175_v14 = vld [vmem:[#allocation27_spill] sm:$0xff] }
  0x65   :  { %v405_v25 = vadd.f32 %v401_v5, %v395_v53  ;;  %v439_v20 = vstv %s2471_s1  ;;  %v2513_v13 = vstv %s2473_s21  ;;  %v2516_v8 = vstv %s2483_s13  ;;  %v3176_v53 = vld [vmem:[#allocation28_spill] sm:$0xff]  ;;  %s2768_s13 = sld [smem:[#allocation2 + $0x384]] }
  0x66   :  { %v2519_v9 = vstv %s2485_s14  ;;  %v350_v50 = vadd.f32 %v2380_v52, %v344_v10  ;;  %v351_v11 = vadd.f32 %v2380_v52, %v345_v17  ;;  %v414_v47 = vadd.f32 %v410_v57, %v404_v26  ;;  %v3177_v52 = vld [vmem:[#allocation29_spill] sm:$0xff]  ;;  %s2837_s21 = sld [smem:[#allocation2 + $0x584]] }
  0x67   :  { %v415_v33 = vadd.f32 %v411_v40, %v405_v25  ;;  %v440_v24 = vmul.f32 %v3173_v54, %v439_v20  ;;  %v441_v63 = vmul.f32 %v3174_v61, %v439_v20  ;;  %v450_v5 = vmul.f32 %v3153_v58, %v2513_v13  ;;  %v3178_v25 = vld [vmem:[#allocation30_spill] sm:$0xff] }
  0x68   :  { %v451_v41 = vmul.f32 %v3175_v14, %v2513_v13  ;;  %v721_v43 = vpack.c.bf16 %v351_v11, %v350_v50  ;;  %v424_v44 = vadd.f32 %v420_v59, %v414_v47  ;;  %v460_v10 = vmul.f32 %v3176_v53, %v2516_v8  ;;  %v3180_v47 = vld [vmem:[#allocation34_spill] sm:$0xff]  ;;  %v3181_v53 = vld [vmem:[#allocation36_spill] sm:$0xff] }
  0x69   :  { %v425_v27 = vadd.f32 %v421_v49, %v415_v33  ;;  %v461_v26 = vmul.f32 %v3177_v52, %v2516_v8  ;;  %v356_v57 = vmul.f32 %v2444_v60, %v3178_v25  ;;  %v357_v40 = vmul.f32 %v2444_v60, %v3158_v42  ;;  %v3179_v49 = vld [vmem:[#allocation33_spill] sm:$0xff] }
  0x6a   :  { %v362_v17 = vmul.f32 %v3159_v56, %v2451_v45  ;;  %1655 = vmatmul.mubr.msk.bf16.gmra.mrb[4].mxu0 %vm736_vm0, %v721_v43  ;;  %v434_v50 = vadd.f32 %v430_v16, %v424_v44  ;;  %v363_v11 = vmul.f32 %v3179_v49, %v2451_v45  ;;  %v372_v33 = vmul.f32 %v3180_v47, %v2454_v30  ;;  %v3182_v44 = vld [vmem:[#allocation39_spill] sm:$0xff] }
  0x6b   :  { %v435_v59 = vadd.f32 %v431_v21, %v425_v27  ;;  %v373_v25 = vmul.f32 %v2143_v28, %v2454_v30  ;;  %v382_v60 = vmul.f32 %v3181_v53, %v2466_v23  ;;  %v383_v56 = vmul.f32 %v3162_v38, %v2466_v23  ;;  %v3183_v27 = vld [vmem:[#allocation40_spill] sm:$0xff] }
  0x6c   :  { %v366_v52 = vadd.f32 %v362_v17, %v356_v57  ;;  %v444_v42 = vadd.f32 %v440_v24, %v434_v50  ;;  %v367_v16 = vadd.f32 %v363_v11, %v357_v40  ;;  %v392_v21 = vmul.f32 %v3163_v51, %v2469_v18  ;;  %v3184_v17 = vld [vmem:[#allocation41_spill] sm:$0xff] }
  0x6d   :  { %v445_v43 = vadd.f32 %v441_v63, %v435_v59  ;;  %v393_v30 = vmul.f32 %v3182_v44, %v2469_v18  ;;  %v402_v57 = vmul.f32 %v3183_v27, %v399_v32  ;;  %v403_v53 = vmul.f32 %v3184_v17, %v399_v32 }
  0x6e   :  { %v376_v45 = vadd.f32 %v372_v33, %v366_v52  ;;  %v454_v28 = vadd.f32 %v450_v5, %v444_v42  ;;  %v377_v24 = vadd.f32 %v373_v25, %v367_v16  ;;  %v412_v63 = vmul.f32 %v3164_v29, %v2489_v22 }
  0x6f   :  { %v455_v23 = vadd.f32 %v451_v41, %v445_v43  ;;  %v413_v52 = vmul.f32 %v2204_v46, %v2489_v22  ;;  %v422_v18 = vmul.f32 %v3165_v15, %v2492_v37  ;;  %v423_v32 = vmul.f32 %v2220_v35, %v2492_v37 }
  0x70   :  { %v386_v40 = vadd.f32 %v382_v60, %v376_v45  ;;  %v464_v42 = vadd.f32 %v460_v10, %v454_v28  ;;  %v387_v41 = vadd.f32 %v383_v56, %v377_v24  ;;  %v432_v25 = vmul.f32 %v3166_v31, %v2495_v36 }
  0x71   :  { %v465_v5 = vadd.f32 %v461_v26, %v455_v23  ;;  %v433_v59 = vmul.f32 %v2234_v48, %v2495_v36  ;;  %v442_v22 = vmul.f32 %v3167_v34, %v439_v20  ;;  %v443_v11 = vmul.f32 %v2252_v0, %v439_v20 }
  0x72   :  { %v396_v50 = vadd.f32 %v392_v21, %v386_v40  ;;  %v470_v28 = vadd.f32 %v2519_v9, %v464_v42  ;;  %v397_v37 = vadd.f32 %v393_v30, %v387_v41  ;;  %v452_v10 = vmul.f32 %v2257_v6, %v2513_v13  ;;  %v3185_v40 = vld [vmem:[#allocation11_spill] sm:$0xff]  ;;  %v3186_v42 = vld [vmem:[#allocation12_spill] sm:$0xff] }
  0x73   :  { %v471_v56 = vadd.f32 %v2519_v9, %v465_v5  ;;  %v453_v36 = vmul.f32 %v2266_v39, %v2513_v13  ;;  %v462_v20 = vmul.f32 %v2271_v55, %v2516_v8  ;;  %v463_v33 = vmul.f32 %v2282_v12, %v2516_v8 }
  0x74   :  { %v406_v26 = vadd.f32 %v402_v57, %v396_v50  ;;  %v407_v43 = vadd.f32 %v403_v53, %v397_v37  ;;  %v2593_v16 = vstv %s2552_s3  ;;  %v2596_v21 = vstv %s2554_s7  ;;  %v3188_v50 = vld [vmem:[#allocation14_spill] sm:$0xff] }
  0x75   :  { %v722_v60 = vpack.c.bf16 %v471_v56, %v470_v28  ;;  %v476_v13 = vmul.f32 %v2593_v16, %v1890_v1  ;;  %v477_v30 = vmul.f32 %v2593_v16, %v1895_v2  ;;  %v482_v8 = vmul.f32 %v1900_v3, %v2596_v21 }
  0x76   :  { %v416_v45 = vadd.f32 %v412_v63, %v406_v26  ;;  %v417_v53 = vadd.f32 %v413_v52, %v407_v43  ;;  %v483_v57 = vmul.f32 %v1907_v4, %v2596_v21  ;;  %v2612_v23 = vstv %s2562_s8  ;;  %v3187_v4 = vld [vmem:[#allocation13_spill] sm:$0xff] }
  0x77   :  { %1658 = vmatprep.mubr.msk.bf16.mxu0 %vm736_vm0, %v722_v60  ;;  %v2615_v24 = vstv %s2564_s18  ;;  %v486_v1 = vadd.f32 %v482_v8, %v476_v13  ;;  %v492_v2 = vmul.f32 %v3185_v40, %v2612_v23  ;;  %v493_v3 = vmul.f32 %v3186_v42, %v2612_v23  ;;  %v3190_v13 = vld [vmem:[#allocation16_spill] sm:$0xff] }
  0x78   :  { %v426_v63 = vadd.f32 %v422_v18, %v416_v45  ;;  %v427_v52 = vadd.f32 %v423_v32, %v417_v53  ;;  %v487_v5 = vadd.f32 %v483_v57, %v477_v30  ;;  %v502_v41 = vmul.f32 %v3187_v4, %v2615_v24  ;;  %v3189_v45 = vld [vmem:[#allocation15_spill] sm:$0xff] }
  0x79   :  { %v503_v28 = vmul.f32 %v3188_v50, %v2615_v24  ;;  %v496_v56 = vadd.f32 %v492_v2, %v486_v1  ;;  %v2630_v37 = vstv %s2578_s28  ;;  %v2633_v26 = vstv %s2580_s12  ;;  %v3192_v4 = vld [vmem:[#allocation19_spill] sm:$0xff]  ;;  %s2792_s12 = sld [smem:[#allocation2 + $0x404]] }
  0x7a   :  { %v436_v18 = vadd.f32 %v432_v25, %v426_v63  ;;  %v437_v60 = vadd.f32 %v433_v59, %v427_v52  ;;  %v497_v43 = vadd.f32 %v493_v3, %v487_v5  ;;  %v512_v32 = vmul.f32 %v3189_v45, %v2630_v37  ;;  %v3191_v3 = vld [vmem:[#allocation18_spill] sm:$0xff] }
  0x7b   :  { %v513_v30 = vmul.f32 %v3190_v13, %v2630_v37  ;;  %v506_v8 = vadd.f32 %v502_v41, %v496_v56  ;;  %v522_v53 = vmul.f32 %v1966_v19, %v2633_v26  ;;  %v523_v59 = vmul.f32 %v3168_v7, %v2633_v26 }
  0x7c   :  { %v446_v25 = vadd.f32 %v442_v22, %v436_v18  ;;  %v447_v57 = vadd.f32 %v443_v11, %v437_v60  ;;  %v507_v63 = vadd.f32 %v503_v28, %v497_v43  ;;  %v2648_v1 = vstv %s2598_s19  ;;  %v3194_v60 = vld [vmem:[#allocation22_spill] sm:$0xff] }
  0x7d   :  { %v2651_v40 = vstv %s2600_s22  ;;  %v516_v42 = vadd.f32 %v512_v32, %v506_v8  ;;  %v532_v22 = vmul.f32 %v3191_v3, %v2648_v1  ;;  %v533_v19 = vmul.f32 %v3192_v4, %v2648_v1  ;;  %v3196_v3 = vld [vmem:[#allocation28_spill] sm:$0xff] }
  0x7e   :  { %v456_v2 = vadd.f32 %v452_v10, %v446_v25  ;;  %v457_v52 = vadd.f32 %v453_v36, %v447_v57  ;;  %v517_v5 = vadd.f32 %v513_v30, %v507_v63  ;;  %v542_v41 = vmul.f32 %v3169_v62, %v2651_v40  ;;  %v3193_v36 = vld [vmem:[#allocation21_spill] sm:$0xff] }
  0x7f   :  { %v526_v11 = vadd.f32 %v522_v53, %v516_v42  ;;  %v2660_v50 = vstv %s2621_s23  ;;  %v2663_v28 = vstv %s2623_s24  ;;  %v543_v56 = vmul.f32 %v3193_v36, %v2651_v40  ;;  %s2879_s24 = sld [smem:[#allocation5 + $0x4]] }
  0x80   :  { %v466_v7 = vadd.f32 %v462_v20, %v456_v2  ;;  %v467_v10 = vadd.f32 %v463_v33, %v457_v52  ;;  %v527_v18 = vadd.f32 %v523_v59, %v517_v5  ;;  %v552_v43 = vmul.f32 %v3194_v60, %v2660_v50  ;;  %v3195_v20 = vld [vmem:[#allocation23_spill] sm:$0xff]  ;;  %v3198_v5 = vld [vmem:[#allocation30_spill] sm:$0xff] }
  0x81   :  { %v536_v45 = vadd.f32 %v532_v22, %v526_v11  ;;  %v553_v32 = vmul.f32 %v3195_v20, %v2660_v50  ;;  %v562_v13 = vmul.f32 %v3173_v54, %v2663_v28  ;;  %v571_v33 = vstv %s2639_s25 }
  0x82   :  { %v472_v62 = vadd.f32 %v2519_v9, %v466_v7  ;;  %v473_v30 = vadd.f32 %v2519_v9, %v467_v10  ;;  %v537_v25 = vadd.f32 %v533_v19, %v527_v18  ;;  %v2679_v8 = vstv %s2641_s9  ;;  %v3197_v9 = vld [vmem:[#allocation29_spill] sm:$0xff]  ;;  %v3199_v19 = vld [vmem:[#allocation31_spill] sm:$0xff] }
  0x83   :  { %v546_v53 = vadd.f32 %v542_v41, %v536_v45  ;;  %v563_v59 = vmul.f32 %v3174_v61, %v2663_v28  ;;  %v572_v57 = vmul.f32 %v3153_v58, %v571_v33  ;;  %v573_v63 = vmul.f32 %v3175_v14, %v571_v33  ;;  %v3200_v58 = vld [vmem:[#allocation32_spill] sm:$0xff]  ;;  %v3201_v10 = vld [vmem:[#allocation35_spill] sm:$0xff] }
  0x84   :  { %v723_v2 = vpack.c.bf16 %v473_v30, %v472_v62  ;;  %v547_v42 = vadd.f32 %v543_v56, %v537_v25  ;;  %v582_v54 = vmul.f32 %v3196_v3, %v2679_v8  ;;  %v583_v22 = vmul.f32 %v3197_v9, %v2679_v8  ;;  %v1740_v9 = vld [vmem:[%s3049_s0 + $0x20] sm:$0xff] }
  0x85   :  { %v556_v52 = vadd.f32 %v552_v43, %v546_v53  ;;  %v478_v4 = vmul.f32 %v2593_v16, %v3198_v5  ;;  %v479_v61 = vmul.f32 %v2593_v16, %v3199_v19  ;;  %v484_v41 = vmul.f32 %v3200_v58, %v2596_v21  ;;  %v3202_v16 = vld [vmem:[#allocation36_spill] sm:$0xff] }
  0x86   :  { %1659 = vmatmul.mubr.msk.bf16.gmra.mrb[8].mxu0 %vm736_vm0, %v723_v2  ;;  %v557_v14 = vadd.f32 %v553_v32, %v547_v42  ;;  %v485_v7 = vmul.f32 %v3179_v49, %v2596_v21  ;;  %v494_v11 = vmul.f32 %v3180_v47, %v2612_v23  ;;  %v495_v18 = vmul.f32 %v3201_v10, %v2612_v23  ;;  %v1743_v58 = vld [vmem:[%s3049_s0 + $0x48] sm:$0xff] }
  0x87   :  { %v566_v36 = vadd.f32 %v562_v13, %v556_v52  ;;  %v2703_v56 = vstv %s2665_s15  ;;  %v488_v60 = vadd.f32 %v484_v41, %v478_v4  ;;  %v504_v43 = vmul.f32 %v3202_v16, %v2615_v24  ;;  %v1741_v52 = vld [vmem:[%s3049_s0 + $0x28] sm:$0xff]  ;;  %v1742_v4 = vld [vmem:[%s3049_s0 + $0x40] sm:$0xff]  ;;  %s2809_s15 = sld [smem:[#allocation2 + $0x484]] }
  0x88   :  { %v567_v62 = vadd.f32 %v563_v59, %v557_v14  ;;  %v489_v45 = vadd.f32 %v485_v7, %v479_v61  ;;  %v505_v49 = vmul.f32 %v3162_v38, %v2615_v24  ;;  %v514_v47 = vmul.f32 %v3163_v51, %v2630_v37  ;;  %v1744_v14 = vld [vmem:[%s3049_s0 + $0x60] sm:$0xff] }
  0x89   :  { %v576_v21 = vadd.f32 %v572_v57, %v566_v36  ;;  %v498_v23 = vadd.f32 %v494_v11, %v488_v60  ;;  %v515_v20 = vmul.f32 %v3182_v44, %v2630_v37  ;;  %v524_v32 = vmul.f32 %v3183_v27, %v2633_v26  ;;  %v1745_v11 = vld [vmem:[%s3049_s0 + $0x68] sm:$0xff] }
  0x8a   :  { %v577_v13 = vadd.f32 %v573_v63, %v567_v62  ;;  %v499_v30 = vadd.f32 %v495_v18, %v489_v45  ;;  %v525_v38 = vmul.f32 %v3184_v17, %v2633_v26  ;;  %v534_v51 = vmul.f32 %v3164_v29, %v2648_v1  ;;  %v1746_v45 = vld [vmem:[%s3049_s0 + $0x80] sm:$0xff] }
  0x8b   :  { %v586_v24 = vadd.f32 %v582_v54, %v576_v21  ;;  %v508_v25 = vadd.f32 %v504_v43, %v498_v23  ;;  %v535_v44 = vmul.f32 %v2204_v46, %v2648_v1  ;;  %v544_v27 = vmul.f32 %v3165_v15, %v2651_v40 }
  0x8c   :  { %v587_v37 = vadd.f32 %v583_v22, %v577_v13  ;;  %v509_v53 = vadd.f32 %v505_v49, %v499_v30  ;;  %v545_v59 = vmul.f32 %v2220_v35, %v2651_v40  ;;  %v554_v17 = vmul.f32 %v3166_v31, %v2660_v50  ;;  %v1748_v13 = vld [vmem:[%s3049_s0 + $0xa0] sm:$0xff] }
  0x8d   :  { %v592_v29 = vadd.f32 %v2703_v56, %v586_v24  ;;  %v518_v26 = vadd.f32 %v514_v47, %v508_v25  ;;  %v555_v46 = vmul.f32 %v2234_v48, %v2660_v50  ;;  %v564_v15 = vmul.f32 %v3167_v34, %v2663_v28 }
  0x8e   :  { %v593_v1 = vadd.f32 %v2703_v56, %v587_v37  ;;  %v519_v57 = vadd.f32 %v515_v20, %v509_v53  ;;  %v565_v35 = vmul.f32 %v2252_v0, %v2663_v28  ;;  %v574_v31 = vmul.f32 %v2257_v6, %v571_v33  ;;  %v1738_v0 = vld [vmem:[%s3049_s0] sm:$0xff] }
  0x8f   :  { %v528_v40 = vadd.f32 %v524_v32, %v518_v26  ;;  %v2749_v63 = vmul.f32 %v2266_v39, %v571_v33  ;;  %v2753_v48 = vmul.f32 %v2271_v55, %v2679_v8  ;;  %v2756_v34 = vstv %s2707_s2  ;;  %v1739_v39 = vld [vmem:[%s3049_s0 + $0x8] sm:$0xff] }
  0x90   :  { %v724_v50 = vpack.c.bf16 %v593_v1, %v592_v29  ;;  %v529_v2 = vadd.f32 %v525_v38, %v519_v57  ;;  %v598_v6 = vmul.f32 %v1738_v0, %v2756_v34  ;;  %v599_v28 = vmul.f32 %v1739_v39, %v2756_v34  ;;  %v1747_v32 = vld [vmem:[%s3049_s0 + $0x88] sm:$0xff] }
  0x91   :  { %v538_v55 = vadd.f32 %v534_v51, %v528_v40  ;;  %v2771_v33 = vstv %s2713_s16  ;;  %v2774_v42 = vstv %s2719_s17  ;;  %v2777_v3 = vstv %s2721_s29  ;;  %s2820_s17 = sld [smem:[#allocation2 + $0x504]]  ;;  %v1749_v38 = vld [vmem:[%s3049_s0 + $0xa8] sm:$0xff] }
  0x92   :  { %1662 = vmatprep.mubr.msk.bf16.mxu0 %vm736_vm0, %v724_v50  ;;  %v539_v54 = vadd.f32 %v535_v44, %v529_v2  ;;  %v604_v22 = vmul.f32 %v1740_v9, %v2771_v33  ;;  %v605_v5 = vmul.f32 %v1741_v52, %v2771_v33  ;;  %v614_v19 = vmul.f32 %v1742_v4, %v2774_v42  ;;  %v1751_v29 = vld [vmem:[%s3049_s0 + $0xc8] sm:$0xff] }
  0x93   :  { %v548_v61 = vadd.f32 %v544_v27, %v538_v55  ;;  %v615_v41 = vmul.f32 %v1743_v58, %v2774_v42  ;;  %v624_v7 = vmul.f32 %v1744_v14, %v2777_v3  ;;  %v625_v10 = vmul.f32 %v1745_v11, %v2777_v3  ;;  %v1753_v50 = vld [vmem:[%s3049_s0 + $0xe8] sm:$0xff] }
  0x94   :  { %v549_v18 = vadd.f32 %v545_v59, %v539_v54  ;;  %v608_v36 = vadd.f32 %v604_v22, %v598_v6  ;;  %v609_v60 = vadd.f32 %v605_v5, %v599_v28  ;;  %v2807_v16 = vstv %s2735_s30  ;;  %v1750_v59 = vld [vmem:[%s3049_s0 + $0xc0] sm:$0xff]  ;;  %v1755_v5 = vld [vmem:[%s3049_s0 + $0x108] sm:$0xff] }
  0x95   :  { %v558_v43 = vadd.f32 %v554_v17, %v548_v61  ;;  %v585_v62 = vmul.f32 %v2282_v12, %v2679_v8  ;;  %v634_v49 = vmul.f32 %v1746_v45, %v2807_v16  ;;  %v2818_v47 = vstv %s2742_s10  ;;  %v1761_v45 = vld [vmem:[%s3049_s0 + $0x30] sm:$0xff] }
  0x96   :  { %v559_v21 = vadd.f32 %v555_v46, %v549_v18  ;;  %v618_v23 = vadd.f32 %v614_v19, %v608_v36  ;;  %v619_v20 = vadd.f32 %v615_v41, %v609_v60  ;;  %v635_v12 = vmul.f32 %v1747_v32, %v2807_v16  ;;  %v1756_v19 = vld [vmem:[%s3049_s0 + $0x120] sm:$0xff]  ;;  %v1759_v36 = vld [vmem:[%s3049_s0 + $0x10] sm:$0xff] }
  0x97   :  { %v568_v8 = vadd.f32 %v564_v15, %v558_v43  ;;  %v644_v30 = vmul.f32 %v1748_v13, %v2818_v47  ;;  %v645_v51 = vmul.f32 %v1749_v38, %v2818_v47  ;;  %v2835_v24 = vstv %s2758_s11  ;;  %v1758_v41 = vld [vmem:[%s3049_s0 + $0x140] sm:$0xff]  ;;  %v1760_v43 = vld [vmem:[%s3049_s0 + $0x18] sm:$0xff] }
  0x98   :  { %v569_v25 = vadd.f32 %v565_v35, %v559_v21  ;;  %v628_v44 = vadd.f32 %v624_v7, %v618_v23  ;;  %v629_v27 = vadd.f32 %v625_v10, %v619_v20  ;;  %v2840_v37 = vstv %s2768_s13  ;;  %v1762_v21 = vld [vmem:[%s3049_s0 + $0x38] sm:$0xff]  ;;  %v1763_v20 = vld [vmem:[%s3049_s0 + $0x50] sm:$0xff] }
  0x99   :  { %v578_v53 = vadd.f32 %v574_v31, %v568_v8  ;;  %v654_v17 = vmul.f32 %v1750_v59, %v2835_v24  ;;  %v655_v26 = vmul.f32 %v1751_v29, %v2835_v24  ;;  %v2852_v57 = vstv %s2792_s12  ;;  %v1752_v31 = vld [vmem:[%s3049_s0 + $0xe0] sm:$0xff]  ;;  %v1764_v8 = vld [vmem:[%s3049_s0 + $0x148] sm:$0xff] }
  0x9a   :  { %v579_v46 = vadd.f32 %v2749_v63, %v569_v25  ;;  %v638_v15 = vadd.f32 %v634_v49, %v628_v44  ;;  %v639_v1 = vadd.f32 %v635_v12, %v629_v27  ;;  %v664_v40 = vmul.f32 %v1752_v31, %v2840_v37  ;;  %v1766_v25 = vld [vmem:[%s3049_s0 + $0x70] sm:$0xff]  ;;  %v1767_v27 = vld [vmem:[%s3049_s0 + $0x78] sm:$0xff] }
  0x9b   :  { %v588_v35 = vadd.f32 %v2753_v48, %v578_v53  ;;  %v665_v2 = vmul.f32 %v1753_v50, %v2840_v37  ;;  %v2864_v39 = vstv %s2809_s15  ;;  %v1754_v48 = vld [vmem:[%s3049_s0 + $0x100] sm:$0xff]  ;;  %v2872_v54 = vstv %s2820_s17  ;;  %v1771_v31 = vld [vmem:[%s3049_s0 + $0x98] sm:$0xff] }
  0x9c   :  { %v589_v63 = vadd.f32 %v585_v62, %v579_v46  ;;  %v648_v0 = vadd.f32 %v644_v30, %v638_v15  ;;  %v649_v6 = vadd.f32 %v645_v51, %v639_v1  ;;  %v674_v55 = vmul.f32 %v1754_v48, %v2852_v57 }
  0x9d   :  { %v594_v28 = vadd.f32 %v2703_v56, %v588_v35  ;;  %v675_v4 = vmul.f32 %v1755_v5, %v2852_v57  ;;  %v684_v61 = vmul.f32 %v1756_v19, %v2864_v39  ;;  %v694_v14 = vmul.f32 %v1758_v41, %v2872_v54 }
  0x9e   :  { %v595_v9 = vadd.f32 %v2703_v56, %v589_v63  ;;  %v658_v22 = vadd.f32 %v654_v17, %v648_v0  ;;  %v659_v52 = vadd.f32 %v655_v26, %v649_v6  ;;  %v1757_v56 = vld [vmem:[%s3049_s0 + $0x128] sm:$0xff]  ;;  %v2894_v7 = vstv %s2837_s21 }
  0x9f   :  { %v685_v58 = vmul.f32 %v1757_v56, %v2864_v39  ;;  %v600_v60 = vmul.f32 %v1759_v36, %v2756_v34  ;;  %v601_v62 = vmul.f32 %v1760_v43, %v2756_v34  ;;  %v606_v49 = vmul.f32 %v1761_v45, %v2771_v33  ;;  %v1769_v26 = vld [vmem:[%s3049_s0 + $0x168] sm:$0xff] }
  0xa0   :  { %v725_v11 = vpack.c.bf16 %v595_v9, %v594_v28  ;;  %v668_v10 = vadd.f32 %v664_v40, %v658_v22  ;;  %v669_v18 = vadd.f32 %v665_v2, %v659_v52  ;;  %v607_v23 = vmul.f32 %v1762_v21, %v2771_v33  ;;  %v1765_v33 = vld [vmem:[%s3049_s0 + $0x58] sm:$0xff]  ;;  %v1772_v28 = vld [vmem:[%s3049_s0 + $0xb0] sm:$0xff] }
  0xa1   :  { %v616_v32 = vmul.f32 %v1763_v20, %v2774_v42  ;;  %v695_v13 = vmul.f32 %v1764_v8, %v2872_v54  ;;  %v617_v30 = vmul.f32 %v1765_v33, %v2774_v42  ;;  %v610_v38 = vadd.f32 %v606_v49, %v600_v60  ;;  %v1768_v42 = vld [vmem:[%s3049_s0 + $0x160] sm:$0xff]  ;;  %v1779_v49 = vld [vmem:[%s3049_s0 + $0x118] sm:$0xff] }
  0xa2   :  { %1663 = vmatmul.mubr.msk.bf16.gmra.mrb[12].mxu0 %vm736_vm0, %v725_v11  ;;  %v678_v34 = vadd.f32 %v674_v55, %v668_v10  ;;  %v679_v12 = vadd.f32 %v675_v4, %v669_v18  ;;  %v611_v51 = vadd.f32 %v607_v23, %v601_v62  ;;  %v626_v44 = vmul.f32 %v1766_v25, %v2777_v3  ;;  %v1773_v55 = vld [vmem:[%s3049_s0 + $0xb8] sm:$0xff]  ;;  %v1774_v4 = vld [vmem:[%s3049_s0 + $0xd0] sm:$0xff] }
  0xa3   :  { %v627_v53 = vmul.f32 %v1767_v27, %v2777_v3  ;;  %v704_v29 = vmul.f32 %v1768_v42, %v2894_v7  ;;  %v705_v46 = vmul.f32 %v1769_v26, %v2894_v7  ;;  %v620_v15 = vadd.f32 %v616_v32, %v610_v38  ;;  %v1770_v3 = vld [vmem:[%s3049_s0 + $0x90] sm:$0xff]  ;;  %v1777_v18 = vld [vmem:[%s3049_s0 + $0xf8] sm:$0xff] }
  0xa4   :  { %v688_v59 = vadd.f32 %v684_v61, %v678_v34  ;;  %v689_v17 = vadd.f32 %v685_v58, %v679_v12  ;;  %v621_v1 = vadd.f32 %v617_v30, %v611_v51  ;;  %v636_v35 = vmul.f32 %v1770_v3, %v2807_v16  ;;  %v1775_v61 = vld [vmem:[%s3049_s0 + $0xd8] sm:$0xff]  ;;  %v1776_v11 = vld [vmem:[%s3049_s0 + $0xf0] sm:$0xff] }
  0xa5   :  { %v637_v40 = vmul.f32 %v1771_v31, %v2807_v16  ;;  %v713_v63 = vstv %s2879_s24  ;;  %v630_v0 = vadd.f32 %v626_v44, %v620_v15  ;;  %v646_v48 = vmul.f32 %v1772_v28, %v2818_v47  ;;  %v1781_v34 = vld [vmem:[%s3049_s0 + $0x138] sm:$0xff]  ;;  %v1736_v15 = vld [vmem:[%s3053_s4] sm:$0xff]  }
  0xa6   :  { %v698_v50 = vadd.f32 %v694_v14, %v688_v59  ;;  %v699_v2 = vadd.f32 %v695_v13, %v689_v17  ;;  %v631_v6 = vadd.f32 %v627_v53, %v621_v1  ;;  %v647_v9 = vmul.f32 %v1773_v55, %v2818_v47  ;;  %v1783_v30 = vld [vmem:[%s3049_s0 + $0x158] sm:$0xff]  ;;  %1672 = vmatprep.mubr.msk.bf16.mxu1 %vm736_vm0, %v1736_v15 }
  0xa7   :  { %v640_v16 = vadd.f32 %v636_v35, %v630_v0  ;;  %v656_v19 = vmul.f32 %v1774_v4, %v2835_v24  ;;  %v657_v56 = vmul.f32 %v1775_v61, %v2835_v24  ;;  %v666_v10 = vmul.f32 %v1776_v11, %v2840_v37  ;;  %v1778_v24 = vld [vmem:[%s3049_s0 + $0x110] sm:$0xff]  ;;  %v1785_v27 = vld [vmem:[%s3049_s0 + $0x178] sm:$0xff] }
  0xa8   :  { %v708_v22 = vadd.f32 %v704_v29, %v698_v50  ;;  %v709_v52 = vadd.f32 %v705_v46, %v699_v2  ;;  %v641_v5 = vadd.f32 %v637_v40, %v631_v6  ;;  %v667_v36 = vmul.f32 %v1777_v18, %v2840_v37  ;;  %v1780_v37 = vld [vmem:[%s3049_s0 + $0x130] sm:$0xff]  ;;  %v1737_v50 = vld [vmem:[%s3053_s4 + $0x8] sm:$0xff]   ;;  %s1842_s4 = smov [#allocation7]  }
  0xa9   :  { %v650_v14 = vadd.f32 %v646_v48, %v640_v16  ;;  %v676_v45 = vmul.f32 %v1778_v24, %v2852_v57  ;;  %v677_v21 = vmul.f32 %v1779_v49, %v2852_v57  ;;  %v686_v32 = vmul.f32 %v1780_v37, %v2864_v39  ;;  %v1782_v57 = vld [vmem:[%s3049_s0 + $0x150] sm:$0xff]  ;;  %s1454_s24 = sshll.u32 %s1842_s4, 4  ;;  %s1455_s24 = int_to_ptr.vmem [resolvable:$true] %s1454_s24 }
  0xaa   :  { %v714_v58 = vadd.f32 %v713_v63, %v708_v22  ;;  %v715_v41 = vadd.f32 %v713_v63, %v709_v52  ;;  %v651_v47 = vadd.f32 %v647_v9, %v641_v5  ;;  %v687_v12 = vmul.f32 %v1781_v34, %v2864_v39  ;;  %v1784_v39 = vld [vmem:[%s3049_s0 + $0x170] sm:$0xff]  ;;  %s1810_s21 = scalar_lea.vmem %s1455_s24, 5120  ;;  %p1815_p11 = scmp.lt.s32.totalorder %s1455_s24, %s1455_s24 }
  0xab   :  { %v660_v43 = vadd.f32 %v656_v19, %v650_v14  ;;  %v696_v33 = vmul.f32 %v1782_v57, %v2872_v54  ;;  %v697_v38 = vmul.f32 %v1783_v30, %v2872_v54  ;;  %v706_v44 = vmul.f32 %v1784_v39, %v2894_v7  ;;  %p1811_p10 = scmp.ne.s32.totalorder %s1455_s24, %s1810_s21  ;;  %p1816_p12 = scmp.lt.s32.totalorder %s1810_s21, %s1810_s21 }
  0xac   :  { %v726_v60 = vpack.c.bf16 %v715_v41, %v714_v58  ;;  %v661_v62 = vadd.f32 %v657_v56, %v651_v47  ;;  %v707_v53 = vmul.f32 %v1785_v27, %v2894_v7 }
  0xad   :  { %v670_v23 = vadd.f32 %v666_v10, %v660_v43  ;;  %p1817_p13 = por %p1816_p12, %p1815_p11 }
  0xae   :  { %1666 = vmatprep.mubr.msk.bf16.mxu0 %vm736_vm0, %v726_v60  ;;  %v671_v20 = vadd.f32 %v667_v36, %v661_v62 }
  0xaf   :  { %v680_v8 = vadd.f32 %v676_v45, %v670_v23  ;;  %p1818_p0 = pnand %p1817_p13, %p1811_p10 }
  0xb0   :  { %v681_v13 = vadd.f32 %v677_v21, %v671_v20 }
  0xb1   :  { %v690_v51 = vadd.f32 %v686_v32, %v680_v8 }
  0xb2   :  { %v691_v25 = vadd.f32 %v687_v12, %v681_v13 }
  0xb3   :  { %v700_v59 = vadd.f32 %v696_v33, %v690_v51 }
  0xb4   :  { %v701_v17 = vadd.f32 %v697_v38, %v691_v25 }
  0xb5   :  { %v710_v42 = vadd.f32 %v706_v44, %v700_v59 }
  0xb6   :  { %v711_v29 = vadd.f32 %v707_v53, %v701_v17 }
  0xb7   :  { %v716_v26 = vadd.f32 %v713_v63, %v710_v42 }
  0xb8   :  { %v717_v54 = vadd.f32 %v713_v63, %v711_v29 }
  0xba   :  { %v727_v46 = vpack.c.bf16 %v717_v54, %v716_v26 }
  0xbc   :  { %1667 = vmatmul.mubr.msk.bf16.gmra.mrb[16].mxu0 %vm736_vm0, %v727_v46 }
  0xbd   :  { %1702 = vmatprep.mubr.msk.bf16.mxu0 %vm736_vm0, %v1736_v15 }
 0x120   :  { %v1652_v1 = vpop.f32.mrb[0].mxu0 }
 0x121   :  { %v801_v3 = vpop.f32.mrb[1].mxu0 }
 0x122   :  { %v1653_v7 = vpop.f32.mrb[2].mxu0 }
 0x123   :  { %v881_v35 = vpack.c.bf16 %v1653_v7, %v1652_v1  ;;  %v804_v31 = vpop.f32.mrb[3].mxu0 }
 0x124   :  { %v880_v40 = vpack.c.bf16 %v804_v31, %v801_v3 }
 0x126   :  { %1670 = vmatprep.subr.bf16.mxu1 %v880_v40 }
 0x127   :  { %1671 = vmatpush3.bf16.msra.mxu1 %v880_v40 }
 0x128   :  { %1676 = vmatprep.subr.bf16.mxu1 %v881_v35 }
 0x12a   :  { %1673 = vmatmul.mubr.msk.bf16.vlgmr.msra.gmra.mrb[0].mxu1 %vm736_vm0, %v1737_v50 }
 0x12b   :  { %1677 = vmatpush3.bf16.msra.mxu1 %v881_v35  ;;  %1678 = vmatprep.mubr.msk.bf16.mxu1 %vm736_vm0, %v1736_v15 }
 0x132   :  { %1679 = vmatmul.mubr.msk.bf16.vlgmr.msra.gmra.mrb[4].mxu1 %vm736_vm0, %v1737_v50 }
 0x133   :  { %1684 = vmatprep.mubr.msk.bf16.mxu1 %vm736_vm0, %v1736_v15 }
 0x13d   :  { %v1656_v2 = vpop.f32.mrb[4].mxu0 }
 0x13e   :  { %v817_v63 = vpop.f32.mrb[5].mxu0 }
 0x13f   :  { %v1657_v0 = vpop.f32.mrb[6].mxu0 }
 0x140   :  { %v883_v6 = vpack.c.bf16 %v1657_v0, %v1656_v2  ;;  %v820_v28 = vpop.f32.mrb[7].mxu0 }
 0x141   :  { %v882_v48 = vpack.c.bf16 %v820_v28, %v817_v63 }
 0x143   :  { %1682 = vmatprep.subr.bf16.mxu1 %v882_v48 }
 0x144   :  { %1683 = vmatpush3.bf16.msra.mxu1 %v882_v48 }
 0x145   :  { %1688 = vmatprep.subr.bf16.mxu1 %v883_v6 }
 0x147   :  { %1685 = vmatmul.mubr.msk.bf16.vlgmr.msra.gmra.mrb[8].mxu1 %vm736_vm0, %v1737_v50 }
 0x148   :  { %1689 = vmatpush3.bf16.msra.mxu1 %v883_v6  ;;  %1690 = vmatprep.mubr.msk.bf16.mxu1 %vm736_vm0, %v1736_v15 }
 0x14f   :  { %1691 = vmatmul.mubr.msk.bf16.vlgmr.msra.gmra.mrb[12].mxu1 %vm736_vm0, %v1737_v50 }
 0x150   :  { %1696 = vmatprep.mubr.msk.bf16.mxu1 %vm736_vm0, %v1736_v15 }
 0x159   :  { %v1660_v55 = vpop.f32.mrb[8].mxu0 }
 0x15a   :  { %v833_v9 = vpop.f32.mrb[9].mxu0 }
 0x15b   :  { %v1661_v22 = vpop.f32.mrb[10].mxu0 }
 0x15c   :  { %v885_v52 = vpack.c.bf16 %v1661_v22, %v1660_v55  ;;  %v836_v16 = vpop.f32.mrb[11].mxu0 }
 0x15d   :  { %v884_v5 = vpack.c.bf16 %v836_v16, %v833_v9 }
 0x15e   :  { %1700 = vmatprep.subr.bf16.mxu0 %v885_v52 }
 0x15f   :  { %1701 = vmatpush3.bf16.msra.mxu0 %v885_v52  ;;  %1694 = vmatprep.subr.bf16.mxu1 %v884_v5 }
 0x160   :  { %1695 = vmatpush3.bf16.msra.mxu1 %v884_v5 }
 0x162   :  { %1703 = vmatmul.mubr.msk.bf16.vlgmr.msra.gmra.mrb[20].mxu0 %vm736_vm0, %v1737_v50 }
 0x163   :  { %1697 = vmatmul.mubr.msk.bf16.vlgmr.msra.gmra.mrb[16].mxu1 %vm736_vm0, %v1737_v50  ;;  %1714 = vmatprep.mubr.msk.bf16.mxu0 %vm736_vm0, %v1736_v15 }
 0x164   :  { %1708 = vmatprep.mubr.msk.bf16.mxu1 %vm736_vm0, %v1736_v15 }
 0x175   :  { %v1664_v4 = vpop.f32.mrb[12].mxu0 }
 0x176   :  { %v849_v19 = vpop.f32.mrb[13].mxu0 }
 0x177   :  { %v1665_v61 = vpop.f32.mrb[14].mxu0 }
 0x178   :  { %v887_v56 = vpack.c.bf16 %v1665_v61, %v1664_v4  ;;  %v852_v58 = vpop.f32.mrb[15].mxu0 }
 0x179   :  { %v886_v41 = vpack.c.bf16 %v852_v58, %v849_v19 }
 0x17a   :  { %1712 = vmatprep.subr.bf16.mxu0 %v887_v56 }
 0x17b   :  { %1706 = vmatprep.subr.bf16.mxu1 %v886_v41  ;;  %1713 = vmatpush3.bf16.msra.mxu0 %v887_v56 }
 0x17c   :  { %1707 = vmatpush3.bf16.msra.mxu1 %v886_v41 }
 0x17e   :  { %1715 = vmatmul.mubr.msk.bf16.vlgmr.msra.gmra.mrb[24].mxu0 %vm736_vm0, %v1737_v50 }
 0x17f   :  { %1709 = vmatmul.mubr.msk.bf16.vlgmr.msra.gmra.mrb[20].mxu1 %vm736_vm0, %v1737_v50  ;;  %1726 = vmatprep.mubr.msk.bf16.mxu0 %vm736_vm0, %v1736_v15 }
 0x180   :  { %1720 = vmatprep.mubr.msk.bf16.mxu1 %vm736_vm0, %v1736_v15 }
 0x18f   :  { %v1668_v14 = vpop.f32.mrb[16].mxu0 }
 0x190   :  { %v865_v47 = vpop.f32.mrb[17].mxu0 }
 0x191   :  { %v1669_v11 = vpop.f32.mrb[18].mxu0 }
 0x192   :  { %v889_v10 = vpack.c.bf16 %v1669_v11, %v1668_v14  ;;  %v868_v18 = vpop.f32.mrb[19].mxu0 }
 0x193   :  { %v888_v36 = vpack.c.bf16 %v868_v18, %v865_v47 }
 0x194   :  { %1724 = vmatprep.subr.bf16.mxu0 %v889_v10 }
 0x195   :  { %1718 = vmatprep.subr.bf16.mxu1 %v888_v36  ;;  %1725 = vmatpush3.bf16.msra.mxu0 %v889_v10 }
 0x196   :  { %1719 = vmatpush3.bf16.msra.mxu1 %v888_v36 }
 0x198   :  { %1727 = vmatmul.mubr.msk.bf16.vlgmr.msra.gmra.mrb[28].mxu0 %vm736_vm0, %v1737_v50 }
 0x199   :  { %1721 = vmatmul.mubr.msk.bf16.vlgmr.msra.gmra.mrb[24].mxu1 %vm736_vm0, %v1737_v50 }
 0x1fd   :  { %v1674_v60 = vpop.f32.mrb[0].mxu1 }
 0x1fe   :  { %961 = vst [vmem:[#allocation7 + $0x10] sm:$0xff] %v1674_v60  ;;  %v944_v43 = vpop.f32.mrb[1].mxu1 }
 0x1ff   :  { %959 = vst [vmem:[#allocation7] sm:$0xff] %v944_v43  ;;  %v1675_v62 = vpop.f32.mrb[2].mxu1 }
 0x200   :  { %962 = vst [vmem:[#allocation7 + $0x18] sm:$0xff] %v1675_v62  ;;  %v947_v24 = vpop.f32.mrb[3].mxu1 }
 0x201   :  { %960 = vst [vmem:[#allocation7 + $0x8] sm:$0xff] %v947_v24 }
 0x205   :  { %v1680_v45 = vpop.f32.mrb[4].mxu1 }
 0x206   :  { %1015 = vst [vmem:[#allocation7 + $0xb0] sm:$0xff] %v1680_v45  ;;  %v997_v49 = vpop.f32.mrb[5].mxu1 }
 0x207   :  { %1013 = vst [vmem:[#allocation7 + $0xa0] sm:$0xff] %v997_v49  ;;  %v1681_v21 = vpop.f32.mrb[6].mxu1 }
 0x208   :  { %1016 = vst [vmem:[#allocation7 + $0xb8] sm:$0xff] %v1681_v21  ;;  %v1000_v23 = vpop.f32.mrb[7].mxu1 }
 0x209   :  { %1014 = vst [vmem:[#allocation7 + $0xa8] sm:$0xff] %v1000_v23 }
 0x21a   :  { %v1686_v20 = vpop.f32.mrb[8].mxu1 }
 0x21b   :  { %1069 = vst [vmem:[#allocation7 + $0x30] sm:$0xff] %v1686_v20  ;;  %v1051_v37 = vpop.f32.mrb[9].mxu1 }
 0x21c   :  { %1067 = vst [vmem:[#allocation7 + $0x20] sm:$0xff] %v1051_v37  ;;  %v1687_v32 = vpop.f32.mrb[10].mxu1 }
 0x21d   :  { %1070 = vst [vmem:[#allocation7 + $0x38] sm:$0xff] %v1687_v32  ;;  %v1054_v34 = vpop.f32.mrb[11].mxu1 }
 0x21e   :  { %1068 = vst [vmem:[#allocation7 + $0x28] sm:$0xff] %v1054_v34 }
 0x222   :  { %v1692_v12 = vpop.f32.mrb[12].mxu1 }
 0x223   :  { %1123 = vst [vmem:[#allocation7 + $0xd0] sm:$0xff] %v1692_v12  ;;  %v1105_v8 = vpop.f32.mrb[13].mxu1 }
 0x224   :  { %1121 = vst [vmem:[#allocation7 + $0xc0] sm:$0xff] %v1105_v8  ;;  %v1693_v13 = vpop.f32.mrb[14].mxu1 }
 0x225   :  { %1124 = vst [vmem:[#allocation7 + $0xd8] sm:$0xff] %v1693_v13  ;;  %v1108_v57 = vpop.f32.mrb[15].mxu1 }
 0x226   :  { %1122 = vst [vmem:[#allocation7 + $0xc8] sm:$0xff] %v1108_v57 }
 0x235   :  { %v1704_v33 = vpop.f32.mrb[20].mxu0 }
 0x236   :  { %v1698_v30 = vpop.f32.mrb[16].mxu1  ;;  %1231 = vst [vmem:[#allocation7 + $0xf0] sm:$0xff] %v1704_v33  ;;  %v1213_v38 = vpop.f32.mrb[21].mxu0 }
 0x237   :  { %1177 = vst [vmem:[#allocation7 + $0x50] sm:$0xff] %v1698_v30  ;;  %v1159_v51 = vpop.f32.mrb[17].mxu1  ;;  %1229 = vst [vmem:[#allocation7 + $0xe0] sm:$0xff] %v1213_v38  ;;  %v1705_v25 = vpop.f32.mrb[22].mxu0 }
 0x238   :  { %1175 = vst [vmem:[#allocation7 + $0x40] sm:$0xff] %v1159_v51  ;;  %v1699_v39 = vpop.f32.mrb[18].mxu1  ;;  %1232 = vst [vmem:[#allocation7 + $0xf8] sm:$0xff] %v1705_v25  ;;  %v1216_v44 = vpop.f32.mrb[23].mxu0 }
 0x239   :  { %1178 = vst [vmem:[#allocation7 + $0x58] sm:$0xff] %v1699_v39  ;;  %v1162_v27 = vpop.f32.mrb[19].mxu1  ;;  %1230 = vst [vmem:[#allocation7 + $0xe8] sm:$0xff] %v1216_v44 }
 0x23a   :  { %1176 = vst [vmem:[#allocation7 + $0x48] sm:$0xff] %v1162_v27 }
 0x251   :  { %v1716_v53 = vpop.f32.mrb[24].mxu0 }
 0x252   :  { %v1710_v59 = vpop.f32.mrb[20].mxu1  ;;  %1339 = vst [vmem:[#allocation7 + $0x110] sm:$0xff] %v1716_v53  ;;  %v1321_v17 = vpop.f32.mrb[25].mxu0 }
 0x253   :  { %1285 = vst [vmem:[#allocation7 + $0x70] sm:$0xff] %v1710_v59  ;;  %v1267_v42 = vpop.f32.mrb[21].mxu1  ;;  %1337 = vst [vmem:[#allocation7 + $0x100] sm:$0xff] %v1321_v17  ;;  %v1717_v29 = vpop.f32.mrb[26].mxu0 }
 0x254   :  { %1283 = vst [vmem:[#allocation7 + $0x60] sm:$0xff] %v1267_v42  ;;  %v1711_v26 = vpop.f32.mrb[22].mxu1  ;;  %1340 = vst [vmem:[#allocation7 + $0x118] sm:$0xff] %v1717_v29  ;;  %v1324_v54 = vpop.f32.mrb[27].mxu0 }
 0x255   :  { %1286 = vst [vmem:[#allocation7 + $0x78] sm:$0xff] %v1711_v26  ;;  %v1270_v46 = vpop.f32.mrb[23].mxu1  ;;  %1338 = vst [vmem:[#allocation7 + $0x108] sm:$0xff] %v1324_v54 }
 0x256   :  { %1284 = vst [vmem:[#allocation7 + $0x68] sm:$0xff] %v1270_v46 }
 0x26b   :  { %v1728_v15 = vpop.f32.mrb[28].mxu0 }
 0x26c   :  { %v1722_v1 = vpop.f32.mrb[24].mxu1  ;;  %1447 = vst [vmem:[#allocation7 + $0x130] sm:$0xff] %v1728_v15  ;;  %v1429_v3 = vpop.f32.mrb[29].mxu0 }
 0x26d   :  { %1393 = vst [vmem:[#allocation7 + $0x90] sm:$0xff] %v1722_v1  ;;  %v1375_v7 = vpop.f32.mrb[25].mxu1  ;;  %1445 = vst [vmem:[#allocation7 + $0x120] sm:$0xff] %v1429_v3  ;;  %v1729_v35 = vpop.f32.mrb[30].mxu0 }
 0x26e   :  { %1391 = vst [vmem:[#allocation7 + $0x80] sm:$0xff] %v1375_v7  ;;  %v1723_v31 = vpop.f32.mrb[26].mxu1  ;;  %1448 = vst [vmem:[#allocation7 + $0x138] sm:$0xff] %v1729_v35  ;;  %v1432_v40 = vpop.f32.mrb[31].mxu0 }
 0x26f   :  { %1394 = vst [vmem:[#allocation7 + $0x98] sm:$0xff] %v1723_v31  ;;  %v1378_v50 = vpop.f32.mrb[27].mxu1  ;;  %1446 = vst [vmem:[#allocation7 + $0x128] sm:$0xff] %v1432_v40 }
 0x270   :  { %1392 = vst [vmem:[#allocation7 + $0x88] sm:$0xff] %v1378_v50 }
 0x271   :  { %1821 = shalt.err (!%p1818_p0)
}
 0x272   :  { %s1822_s7 = scalar_lea.hbm %s3054_s5, 5120 }
 0x273   :  { %p1823_p1 = scmp.ne.s32.totalorder %s3054_s5, %s1822_s7  ;;  %p1826_p2 = scmp.lt.u32.totalorder %s1822_s7, %s3054_s5 }
 0x275   :  { %p1828_p3 = pnand %p1826_p2, %p1823_p1 }
 0x277   :  { %1831 = shalt.err (!%p1828_p3)
}
 0x278   :  { %1460 = dma.vmem_to_hbm [thread:$0]  %s1455_s24, 5120, %s3054_s5, [#allocation3], %s1839_s26, %s1839_s26, %s1840_s27  }
 0x279   :  { %1836 = dma.done.wait [#allocation3], 5120  }
 0x27a   :  { %1837 = vsyncadd [#allocation3], 4294962176 }
 0x27b   :  { %1464 = vsyncpa [#allocation3], 1 }
 0x27c   :  { %1465 = vsyncpa [#allocation4], 1 }
 0x27d   :  { %1466 = vsyncpa [#allocation6], 1 }

</bundles_post_ra>
